<compile_context>
chip_gen: v5e
topology: v5e:2x2
jax: 0.10.0
libtpu: 0.0.40
codegen_flags: <defaults>
</compile_context>

<pallas_src>
import functools

import jax
import jax.numpy as jnp
from jax.experimental import pallas as pl
from jax.experimental.pallas import tpu as pltpu

LANE = 128


def _round_up(x, m):
    return ((x + m - 1) // m) * m


# ----------------------------------------------------------------------------
# Fused Pallas kernel: conv(all K, im2col) + max-pool-over-time + bias + relu + fc1
# ----------------------------------------------------------------------------

def cnn_text_fused_kernel(x_ref, wconv_ref, bconv_ref, wfc_ref, bfc_ref,
                          feat_ref, logit_ref, *, kernel_sizes, groups, n_groups):
    """
    x_ref:     (TILE_N, W, D)          bf16  embedded tokens (batch tile)
    wconv_ref: (sum_K K*D, feat_pad)   bf16  conv weights; kernel i occupies rows
                                             [row_off_i, row_off_i + K_i*D) and the
                                             Co lanes of its group/lane offset
    bconv_ref: (1, feat_pad)           f32   conv biases, packed to the same lanes
    wfc_ref:   (feat_pad, c_pad)       bf16  fc1 weight in packed-feature layout
    bfc_ref:   (1, c_pad)              f32   fc1 bias (zero padded)
    feat_ref:  (TILE_N, feat_pad)      f32   packed pooled features (output)
    logit_ref: (TILE_N, c_pad)         f32   padded logits (output)
    """
    tile_n, w_len, d = x_ref.shape
    x = x_ref[...]                                           # (TILE_N, W, D) bf16

    group_feats = [None] * n_groups
    row_off = 0
    for i, k_size in enumerate(kernel_sizes):
        t_len = w_len - k_size + 1
        g = groups[i]
        # im2col on the small bf16 input: (TILE_N, T, K*D).
        lhs = jnp.concatenate([x[:, k:k + t_len, :] for k in range(k_size)],
                              axis=-1)
        w_blk = wconv_ref[row_off:row_off + k_size * d,
                          g * LANE:(g + 1) * LANE]           # (K*D, 128) bf16
        # Conv over all taps of this kernel size = ONE MXU matmul (contraction K*D).
        y = jnp.dot(lhs.reshape(tile_n * t_len, k_size * d), w_blk,
                    preferred_element_type=jnp.float32)
        y = y.reshape(tile_n, t_len, LANE)
        mx = jnp.max(y, axis=1)                              # (TILE_N, 128) f32
        # Kernel sizes sharing a lane group have disjoint non-zero lanes (their weight
        # columns are zero elsewhere), so the packed pooled features are a plain sum.
        group_feats[g] = mx if group_feats[g] is None else group_feats[g] + mx
        row_off += k_size * d

    feat = group_feats[0] if n_groups == 1 else jnp.concatenate(group_feats, axis=1)
    # relu(max_t(conv_t) + b) == max_t(relu(conv_t + b)): bias hoisted out of the pool.
    feat = jnp.maximum(feat + bconv_ref[...], 0.0)           # (TILE_N, feat_pad) f32
    feat_ref[...] = feat                                     # lane-dense store
    logit_ref[...] = (jnp.dot(feat.astype(jnp.bfloat16), wfc_ref[...],
                              preferred_element_type=jnp.float32) + bfc_ref[...])


# ----------------------------------------------------------------------------
# Tiling / VMEM heuristics
# ----------------------------------------------------------------------------

def _vmem_budget():
    """(tile-sizing budget, explicit vmem_limit_bytes), per TPU generation."""
    cap = 64 << 20                                   # conservative default (v7x per-TC)
    try:
        info = pltpu.get_tpu_info()
        cap = int(getattr(info, "vmem_capacity_bytes", cap) or cap)
    except Exception:
        pass
    budget = max(6 << 20, int(cap * 0.30))           # what the tile heuristic may fill
    limit = max(budget + (4 << 20),
                min(cap - (4 << 20), int(cap * 0.60)))  # headroom for Mosaic scratch
    return budget, limit


def _pick_tile_n(n, w_len, d, kernel_sizes, feat_pad, c_pad, budget):
    """Batch tile from a per-generation VMEM budget.

    Accounts for the double-buffered x tile and outputs plus the largest in-kernel
    im2col + f32 conv intermediate (kernel sizes run sequentially, so max not sum).
    """
    inter = 0
    for k in kernel_sizes:
        t = w_len - k + 1
        # im2col LHS (bf16, counted ~2x for slice/concat copies) + f32 dot result.
        inter = max(inter, t * (2 * k * d * 2 + LANE * 4))
    per_row = (2 * w_len * d * 2        # x tile (bf16), double-buffered
               + 2 * feat_pad * 4       # feature output, double-buffered
               + 2 * c_pad * 4          # logit output, double-buffered
               + inter)
    tile = max(8, min(256, (budget // max(per_row, 1) // 8) * 8))
    # TODO(synk): for very long sequences even tile=8 can exceed the budget; add an
    # in-kernel time-chunk loop with a running max instead of shrinking further.
    n8 = _round_up(n, 8)
    tile = min(tile, n8)
    # v7x megacore: make sure the batch grid has >= 2 steps when the batch allows it.
    if tile == n8 and n8 >= 16:
        tile = _round_up(n8 // 2, 8)
    return tile


# ----------------------------------------------------------------------------
# Wrapper
# ----------------------------------------------------------------------------

def cnn_text_forward(params, x0, y0=None):
    """Eval-mode CNN_Text forward. x0: (N, W) int32 token ids -> (logit, features, y0)."""
    ks = params["kernel_sizes"]
    co = params["kernel_num"]
    c_num = params["class_num"]
    c_pad = params["c_pad"]
    feat_pad = params["feat_pad"]
    groups = params["groups"]
    lane_offs = params["lane_offs"]
    n_groups = params["n_groups"]
    n_k = len(ks)
    n_taps = sum(ks)

    # Embedding lookup is a gather; kept in plain JAX (bf16 table -> bf16 gather).
    # TODO(synk): fuse the gather into the kernel (PrefetchScalarGridSpec + row DMA)
    # so x_emb never round-trips HBM at production sizes.
    x_emb = jnp.take(params["embed"], x0, axis=0)            # (N, W, D) bf16
    n, w_len, d = x_emb.shape
    assert w_len >= max(ks), "seq_len must be >= max(kernel_sizes)"

    budget, vmem_limit = _vmem_budget()
    tile_n = _pick_tile_n(n, w_len, d, ks, feat_pad, c_pad, budget)
    n_pad = _round_up(n, tile_n)
    x_bf16 = x_emb
    if n_pad != n:
        x_bf16 = jnp.pad(x_bf16, ((0, n_pad - n), (0, 0), (0, 0)))

    kern = functools.partial(cnn_text_fused_kernel, kernel_sizes=ks,
                             groups=groups, n_groups=n_groups)
    feat_p, logit_p = pl.pallas_call(
        kern,
        grid=(n_pad // tile_n,),
        in_specs=[
            pl.BlockSpec((tile_n, w_len, d), lambda i: (i, 0, 0)),
            pl.BlockSpec((n_taps * d, feat_pad), lambda i: (0, 0)),
            pl.BlockSpec((1, feat_pad), lambda i: (0, 0)),
            pl.BlockSpec((feat_pad, c_pad), lambda i: (0, 0)),
            pl.BlockSpec((1, c_pad), lambda i: (0, 0)),
        ],
        out_specs=(
            pl.BlockSpec((tile_n, feat_pad), lambda i: (i, 0)),
            pl.BlockSpec((tile_n, c_pad), lambda i: (i, 0)),
        ),
        out_shape=(
            jax.ShapeDtypeStruct((n_pad, feat_pad), jnp.float32),
            jax.ShapeDtypeStruct((n_pad, c_pad), jnp.float32),
        ),
        # Batch axis is independent -> shards across v7x's 2 TensorCores.
        compiler_params=pltpu.CompilerParams(
            dimension_semantics=("parallel",),
            vmem_limit_bytes=int(vmem_limit)),
    )(x_bf16, params["conv_w_packed"], params["conv_b_packed"],
      params["fc1_w_packed"], params["fc1_b_packed"])

    # De-interleave packed lanes + strip batch/lane padding (plain-JAX glue).
    feats = jnp.concatenate(
        [feat_p[:n, groups[i] * LANE + lane_offs[i]:
                    groups[i] * LANE + lane_offs[i] + co]
         for i in range(n_k)], axis=1)
    logit = logit_p[:n, :c_num]
    return logit, feats, y0


# ----------------------------------------------------------------------------
# Deterministic parameter init (matches nn.Module shapes) + packed kernel layout
# ----------------------------------------------------------------------------

def init_params(key, vocab_size, embed_dim, kernel_num, kernel_sizes, class_num):
    kernel_sizes = tuple(kernel_sizes)
    assert kernel_num <= LANE, "TODO(synk): lane packing assumes kernel_num <= 128"
    n_k = len(kernel_sizes)
    n_taps = sum(kernel_sizes)
    c_pad = _round_up(class_num, LANE)

    # Pack the Co channels of consecutive kernel sizes into shared 128-lane groups.
    groups, lane_offs = [], []
    g, off = 0, 0
    for _ in kernel_sizes:
        if off + kernel_num > LANE:
            g, off = g + 1, 0
        groups.append(g)
        lane_offs.append(off)
        off += kernel_num
    n_groups = g + 1
    feat_pad = n_groups * LANE

    keys = jax.random.split(key, 3 + 2 * n_k)
    # nn.Embedding(vocab_size, embed_dim).weight : (V, D)
    embed_f32 = 0.1 * jax.random.normal(keys[0], (vocab_size, embed_dim), jnp.float32)

    conv_w_ref, conv_b_ref = [], []
    wconv = jnp.zeros((n_taps * embed_dim, feat_pad), jnp.float32)
    bconv = jnp.zeros((1, feat_pad), jnp.float32)
    row_off = 0
    for i, k_size in enumerate(kernel_sizes):
        # nn.Conv2d(1, Co, (K, D)).weight : (Co, 1, K, D)
        w = 0.1 * jax.random.normal(keys[1 + 2 * i],
                                    (kernel_num, 1, k_size, embed_dim), jnp.float32)
        b = 0.1 * jax.random.normal(keys[2 + 2 * i], (kernel_num,), jnp.float32)
        w_kdc = jnp.transpose(w[:, 0, :, :], (1, 2, 0))        # (K, D, Co)
        conv_w_ref.append(w_kdc)
        conv_b_ref.append(b)
        col = groups[i] * LANE + lane_offs[i]
        wconv = wconv.at[row_off:row_off + k_size * embed_dim,
                         col:col + kernel_num].set(
            w_kdc.reshape(k_size * embed_dim, kernel_num))      # im2col row order (k, d)
        bconv = bconv.at[0, col:col + kernel_num].set(b)
        row_off += k_size * embed_dim

    feat_dim = n_k * kernel_num
    # nn.Linear(len(Ks)*Co, class_num).weight : (C, F), bias : (C,)
    fc1_w = 0.1 * jax.random.normal(keys[-2], (class_num, feat_dim), jnp.float32)
    fc1_b = 0.1 * jax.random.normal(keys[-1], (class_num,), jnp.float32)

    # fc1 weight in the packed-feature layout used inside the kernel.
    wfc = jnp.zeros((feat_pad, c_pad), jnp.float32)
    for i in range(n_k):
        col = groups[i] * LANE + lane_offs[i]
        blk = fc1_w[:, i * kernel_num:(i + 1) * kernel_num].T   # (Co, C)
        wfc = wfc.at[col:col + kernel_num, :class_num].set(blk)
    bfc = jnp.zeros((1, c_pad), jnp.float32).at[0, :class_num].set(fc1_b)

    return {
        "kernel_sizes": kernel_sizes,
        "kernel_num": kernel_num,
        "class_num": class_num,
        "c_pad": c_pad,
        "feat_pad": feat_pad,
        "groups": tuple(groups),
        "lane_offs": tuple(lane_offs),
        "n_groups": n_groups,
        # bf16 embedding table -> the gather output is already bf16.
        "embed": embed_f32.astype(jnp.bfloat16),
        # packed / padded kernel params (bf16 matmul operands, f32 biases)
        "conv_w_packed": wconv.astype(jnp.bfloat16),
        "conv_b_packed": bconv,
        "fc1_w_packed": wfc.astype(jnp.bfloat16),
        "fc1_b_packed": bfc,
        # reference-layout f32 copies (for the correctness check only)
        "conv_w_ref": conv_w_ref,
        "conv_b_ref": conv_b_ref,
        "fc1_w_ref": fc1_w,
        "fc1_b_ref": fc1_b,
    }


if __name__ == "__main__":
    key = jax.random.PRNGKey(0)
    k_param, k_ids = jax.random.split(key)

    vocab_size, embed_dim = 100, 32
    kernel_num, kernel_sizes, class_num = 8, (3, 4, 5), 4
    batch, seq = 2, 16

    params = init_params(k_param, vocab_size, embed_dim,
                         kernel_num, kernel_sizes, class_num)
    x0 = jax.random.randint(k_ids, (batch, seq), 0, vocab_size, dtype=jnp.int32)
    y0 = jnp.zeros((batch, class_num), jnp.float32)

    logit, feats, y_out = cnn_text_forward(params, x0, y0)
    jax.block_until_ready((logit, feats))

    # Pure-JAX f32 reference of the same math (same bf16-rounded embedding table).
    x_emb = jnp.take(params["embed"], x0, axis=0).astype(jnp.float32)
    ref_feats = []
    for i, k_size in enumerate(kernel_sizes):
        wk = params["conv_w_ref"][i]                      # (K, D, Co)
        bk = params["conv_b_ref"][i]
        t_len = seq - k_size + 1
        conv = jnp.stack(
            [sum(x_emb[:, t + k, :] @ wk[k] for k in range(k_size)) + bk
             for t in range(t_len)], axis=1)              # (N, T, Co)
        ref_feats.append(jnp.max(jax.nn.relu(conv), axis=1))
    ref_x = jnp.concatenate(ref_feats, axis=1)
    ref_logit = ref_x @ params["fc1_w_ref"].T + params["fc1_b_ref"]

    assert logit.shape == (batch, class_num)
    assert feats.shape == (batch, len(kernel_sizes) * kernel_num)
    # bf16 matmul operands (f32 accumulate) -> loosened tolerance vs f32 reference.
    assert jnp.allclose(feats, ref_x, atol=2e-2), (
        "feature mismatch", float(jnp.max(jnp.abs(feats - ref_x))))
    assert jnp.allclose(logit, ref_logit, atol=2e-2), (
        "logit mismatch", float(jnp.max(jnp.abs(logit - ref_logit))))

    print("KERNEL_OK")
</pallas_src>

<mosaic_0001>
module attributes {stable_mosaic.version = 11 : i64} {
  func.func @cnn_text_fused_kernel(%arg0: i32, %arg1: memref<8x16x32xbf16, #tpu.memory_space<vmem>>, %arg2: memref<384x128xbf16, #tpu.memory_space<vmem>>, %arg3: memref<1x128xf32, #tpu.memory_space<vmem>>, %arg4: memref<128x128xbf16, #tpu.memory_space<vmem>>, %arg5: memref<1x128xf32, #tpu.memory_space<vmem>>, %arg6: memref<8x128xf32, #tpu.memory_space<vmem>>, %arg7: memref<8x128xf32, #tpu.memory_space<vmem>>) attributes {dimension_semantics = [#tpu.dimension_semantics<parallel>], iteration_bounds = array<i64: 1>, scalar_prefetch = 0 : i64, scratch_operands = 0 : i64, tpu.core_type = #tpu.core_type<tc>, window_params = [{transform_indices = @transform_0, window_bounds = array<i64: 8, 16, 32>}, {pipeline_mode = #tpu.pipeline_mode<synchronous>, transform_indices = @transform_1, window_bounds = array<i64: 384, 128>}, {pipeline_mode = #tpu.pipeline_mode<synchronous>, transform_indices = @transform_2, window_bounds = array<i64: 1, 128>}, {pipeline_mode = #tpu.pipeline_mode<synchronous>, transform_indices = @transform_3, window_bounds = array<i64: 128, 128>}, {pipeline_mode = #tpu.pipeline_mode<synchronous>, transform_indices = @transform_4, window_bounds = array<i64: 1, 128>}, {transform_indices = @transform_5, window_bounds = array<i64: 8, 128>}, {transform_indices = @transform_6, window_bounds = array<i64: 8, 128>}]} {
    %c0 = arith.constant 0 : index
    %c0_0 = arith.constant 0 : index
    %c0_1 = arith.constant 0 : index
    %0 = vector.load %arg1[%c0, %c0_0, %c0_1] : memref<8x16x32xbf16, #tpu.memory_space<vmem>>, vector<8x16x32xbf16>
    %1 = vector.extract_strided_slice %0 {offsets = [0, 0, 0], sizes = [8, 14, 32], strides = [1, 1, 1]} : vector<8x16x32xbf16> to vector<8x14x32xbf16>
    %2 = vector.extract_strided_slice %0 {offsets = [0, 1, 0], sizes = [8, 14, 32], strides = [1, 1, 1]} : vector<8x16x32xbf16> to vector<8x14x32xbf16>
    %3 = vector.extract_strided_slice %0 {offsets = [0, 2, 0], sizes = [8, 14, 32], strides = [1, 1, 1]} : vector<8x16x32xbf16> to vector<8x14x32xbf16>
    %4 = tpu.concatenate %1, %2, %3 in 2 : vector<8x14x32xbf16>, vector<8x14x32xbf16>, vector<8x14x32xbf16> -> vector<8x14x96xbf16>
    %c0_2 = arith.constant 0 : index
    %c0_3 = arith.constant 0 : index
    %5 = vector.load %arg2[%c0_2, %c0_3] : memref<384x128xbf16, #tpu.memory_space<vmem>>, vector<96x128xbf16>
    %6 = vector.shape_cast %4 : vector<8x14x96xbf16> to vector<112x96xbf16>
    %cst = arith.constant dense<0.000000e+00> : vector<112x128xf32>
    %7 = tpu.matmul %6, %5, %cst {dimension_numbers = #tpu.dot_dimension_numbers<[1], [0], [0], [1], [0, 0, 1, 1], [], []>} : vector<112x96xbf16>, vector<96x128xbf16>, vector<112x128xf32> -> vector<112x128xf32>
    %8 = vector.shape_cast %7 : vector<112x128xf32> to vector<8x14x128xf32>
    %cst_4 = arith.constant dense<0xFF800000> : vector<8x128xf32>
    %9 = vector.multi_reduction <maximumf>, %8, %cst_4 [1] : vector<8x14x128xf32> to vector<8x128xf32>
    %10 = vector.extract_strided_slice %0 {offsets = [0, 0, 0], sizes = [8, 13, 32], strides = [1, 1, 1]} : vector<8x16x32xbf16> to vector<8x13x32xbf16>
    %11 = vector.extract_strided_slice %0 {offsets = [0, 1, 0], sizes = [8, 13, 32], strides = [1, 1, 1]} : vector<8x16x32xbf16> to vector<8x13x32xbf16>
    %12 = vector.extract_strided_slice %0 {offsets = [0, 2, 0], sizes = [8, 13, 32], strides = [1, 1, 1]} : vector<8x16x32xbf16> to vector<8x13x32xbf16>
    %13 = vector.extract_strided_slice %0 {offsets = [0, 3, 0], sizes = [8, 13, 32], strides = [1, 1, 1]} : vector<8x16x32xbf16> to vector<8x13x32xbf16>
    %14 = tpu.concatenate %10, %11, %12, %13 in 2 : vector<8x13x32xbf16>, vector<8x13x32xbf16>, vector<8x13x32xbf16>, vector<8x13x32xbf16> -> vector<8x13x128xbf16>
    %c96 = arith.constant 96 : index
    %c0_5 = arith.constant 0 : index
    %15 = vector.load %arg2[%c96, %c0_5] : memref<384x128xbf16, #tpu.memory_space<vmem>>, vector<128x128xbf16>
    %16 = vector.shape_cast %14 : vector<8x13x128xbf16> to vector<104x128xbf16>
    %cst_6 = arith.constant dense<0.000000e+00> : vector<104x128xf32>
    %17 = tpu.matmul %16, %15, %cst_6 {dimension_numbers = #tpu.dot_dimension_numbers<[1], [0], [0], [1], [0, 0, 1, 1], [], []>} : vector<104x128xbf16>, vector<128x128xbf16>, vector<104x128xf32> -> vector<104x128xf32>
    %18 = vector.shape_cast %17 : vector<104x128xf32> to vector<8x13x128xf32>
    %cst_7 = arith.constant dense<0xFF800000> : vector<8x128xf32>
    %19 = vector.multi_reduction <maximumf>, %18, %cst_7 [1] : vector<8x13x128xf32> to vector<8x128xf32>
    %20 = arith.addf %9, %19 : vector<8x128xf32>
    %21 = vector.extract_strided_slice %0 {offsets = [0, 0, 0], sizes = [8, 12, 32], strides = [1, 1, 1]} : vector<8x16x32xbf16> to vector<8x12x32xbf16>
    %22 = vector.extract_strided_slice %0 {offsets = [0, 1, 0], sizes = [8, 12, 32], strides = [1, 1, 1]} : vector<8x16x32xbf16> to vector<8x12x32xbf16>
    %23 = vector.extract_strided_slice %0 {offsets = [0, 2, 0], sizes = [8, 12, 32], strides = [1, 1, 1]} : vector<8x16x32xbf16> to vector<8x12x32xbf16>
    %24 = vector.extract_strided_slice %0 {offsets = [0, 3, 0], sizes = [8, 12, 32], strides = [1, 1, 1]} : vector<8x16x32xbf16> to vector<8x12x32xbf16>
    %25 = vector.extract_strided_slice %0 {offsets = [0, 4, 0], sizes = [8, 12, 32], strides = [1, 1, 1]} : vector<8x16x32xbf16> to vector<8x12x32xbf16>
    %26 = tpu.concatenate %21, %22, %23, %24, %25 in 2 : vector<8x12x32xbf16>, vector<8x12x32xbf16>, vector<8x12x32xbf16>, vector<8x12x32xbf16>, vector<8x12x32xbf16> -> vector<8x12x160xbf16>
    %c224 = arith.constant 224 : index
    %c0_8 = arith.constant 0 : index
    %27 = vector.load %arg2[%c224, %c0_8] : memref<384x128xbf16, #tpu.memory_space<vmem>>, vector<160x128xbf16>
    %28 = vector.shape_cast %26 : vector<8x12x160xbf16> to vector<96x160xbf16>
    %cst_9 = arith.constant dense<0.000000e+00> : vector<96x128xf32>
    %29 = tpu.matmul %28, %27, %cst_9 {dimension_numbers = #tpu.dot_dimension_numbers<[1], [0], [0], [1], [0, 0, 1, 1], [], []>} : vector<96x160xbf16>, vector<160x128xbf16>, vector<96x128xf32> -> vector<96x128xf32>
    %30 = vector.shape_cast %29 : vector<96x128xf32> to vector<8x12x128xf32>
    %cst_10 = arith.constant dense<0xFF800000> : vector<8x128xf32>
    %31 = vector.multi_reduction <maximumf>, %30, %cst_10 [1] : vector<8x12x128xf32> to vector<8x128xf32>
    %32 = arith.addf %20, %31 : vector<8x128xf32>
    %c0_11 = arith.constant 0 : index
    %c0_12 = arith.constant 0 : index
    %33 = vector.load %arg3[%c0_11, %c0_12] : memref<1x128xf32, #tpu.memory_space<vmem>>, vector<1x128xf32>
    %34 = vector.broadcast %33 : vector<1x128xf32> to vector<8x128xf32>
    %35 = arith.addf %32, %34 : vector<8x128xf32>
    %cst_13 = arith.constant 0.000000e+00 : f32
    %36 = vector.broadcast %cst_13 : f32 to vector<8x128xf32>
    %37 = arith.maximumf %35, %36 : vector<8x128xf32>
    %c0_14 = arith.constant 0 : index
    %c0_15 = arith.constant 0 : index
    %38 = vector.load %arg6[%c0_14, %c0_15] : memref<8x128xf32, #tpu.memory_space<vmem>>, vector<8x128xf32>
    tpu.vector_store %arg6[%c0_14, %c0_15], %37 {strides = array<i32>} : memref<8x128xf32, #tpu.memory_space<vmem>>, vector<8x128xf32>,
    %39 = arith.truncf %37 : vector<8x128xf32> to vector<8x128xbf16>
    %c0_16 = arith.constant 0 : index
    %c0_17 = arith.constant 0 : index
    %40 = vector.load %arg4[%c0_16, %c0_17] : memref<128x128xbf16, #tpu.memory_space<vmem>>, vector<128x128xbf16>
    %cst_18 = arith.constant dense<0.000000e+00> : vector<8x128xf32>
    %41 = tpu.matmul %39, %40, %cst_18 {dimension_numbers = #tpu.dot_dimension_numbers<[1], [0], [0], [1], [0, 0, 1, 1], [], []>} : vector<8x128xbf16>, vector<128x128xbf16>, vector<8x128xf32> -> vector<8x128xf32>
    %c0_19 = arith.constant 0 : index
    %c0_20 = arith.constant 0 : index
    %42 = vector.load %arg5[%c0_19, %c0_20] : memref<1x128xf32, #tpu.memory_space<vmem>>, vector<1x128xf32>
    %43 = vector.broadcast %42 : vector<1x128xf32> to vector<8x128xf32>
    %44 = arith.addf %41, %43 : vector<8x128xf32>
    %c0_21 = arith.constant 0 : index
    %c0_22 = arith.constant 0 : index
    %45 = vector.load %arg7[%c0_21, %c0_22] : memref<8x128xf32, #tpu.memory_space<vmem>>, vector<8x128xf32>
    tpu.vector_store %arg7[%c0_21, %c0_22], %44 {strides = array<i32>} : memref<8x128xf32, #tpu.memory_space<vmem>>, vector<8x128xf32>,
    return
  }
  func.func @transform_0(%arg0: i32) -> (i32, i32, i32) {
    %c0_i32 = arith.constant 0 : i32
    %c0_i32_0 = arith.constant 0 : i32
    %c0_i32_1 = arith.constant 0 : i32
    return %arg0, %c0_i32, %c0_i32_0 : i32, i32, i32
  }
  func.func @transform_1(%arg0: i32) -> (i32, i32) {
    %c0_i32 = arith.constant 0 : i32
    %c0_i32_0 = arith.constant 0 : i32
    %c0_i32_1 = arith.constant 0 : i32
    return %c0_i32, %c0_i32_0 : i32, i32
  }
  func.func @transform_2(%arg0: i32) -> (i32, i32) {
    %c0_i32 = arith.constant 0 : i32
    %c0_i32_0 = arith.constant 0 : i32
    %c0_i32_1 = arith.constant 0 : i32
    return %c0_i32, %c0_i32_0 : i32, i32
  }
  func.func @transform_3(%arg0: i32) -> (i32, i32) {
    %c0_i32 = arith.constant 0 : i32
    %c0_i32_0 = arith.constant 0 : i32
    %c0_i32_1 = arith.constant 0 : i32
    return %c0_i32, %c0_i32_0 : i32, i32
  }
  func.func @transform_4(%arg0: i32) -> (i32, i32) {
    %c0_i32 = arith.constant 0 : i32
    %c0_i32_0 = arith.constant 0 : i32
    %c0_i32_1 = arith.constant 0 : i32
    return %c0_i32, %c0_i32_0 : i32, i32
  }
  func.func @transform_5(%arg0: i32) -> (i32, i32) {
    %c0_i32 = arith.constant 0 : i32
    %c0_i32_0 = arith.constant 0 : i32
    return %arg0, %c0_i32 : i32, i32
  }
  func.func @transform_6(%arg0: i32) -> (i32, i32) {
    %c0_i32 = arith.constant 0 : i32
    %c0_i32_0 = arith.constant 0 : i32
    return %arg0, %c0_i32 : i32, i32
  }
}

</mosaic_0001>

<bundles_post_ra>
// kernel: tpu_custom_call.1
= control target key start
LH: loop header
LB: loop body
LE: loop exit
PB: predicated region body
PF: predicated region fallthrough
CT: control target
= control target key end

     0   :  { %12 = vsyncpa [#allocation3], 0  ;;  %s3256_s0 = inlined_call_operand.hbm [shape: bf16[8,16,32], index: 0, kind: input, shape index: {}]   ;;  %s3257_s1 = inlined_call_operand.hbm [shape: bf16[384,128], index: 1, kind: input, shape index: {}]   ;;  %s3258_s2 = inlined_call_operand.vmem [shape: f32[1,128], index: 2, kind: input, shape index: {}]   ;;  %s3259_s3 = inlined_call_operand.hbm [shape: bf16[128,128], index: 3, kind: input, shape index: {}]   ;;  %s3260_s4 = inlined_call_operand.vmem [shape: f32[1,128], index: 4, kind: input, shape index: {}]   ;;  %s3261_s5 = inlined_call_operand.hbm [shape: f32[8,128], index: 5, kind: output, shape index: {0}]   ;;  %s3262_s6 = inlined_call_operand.hbm [shape: f32[8,128], index: 6, kind: output, shape index: {1}]  }
   0x1   :  { %13 = vsyncpa [#allocation6], 0 }
   0x2   :  { %14 = vsyncpa [#allocation4], 0 }
   0x3   :  { %15 = vsyncpa [#allocation10], 0  ;;  %s33_s23 = sshll.u32 %s3257_s1, 4  ;;  %s2645_s24 = smov [#allocation5]   ;;  %s34_s23 = int_to_ptr.hbm [resolvable:$true] %s33_s23 }
   0x4   :  { %s35_s25 = sshll.u32 %s2645_s24, 4  ;;  %s20_s28 = sshll.u32 %s3256_s0, 4  ;;  %s36_s25 = int_to_ptr.vmem [resolvable:$true] %s35_s25  ;;  %s21_s28 = int_to_ptr.hbm [resolvable:$true] %s20_s28 }
   0x5   :  { %s2646_s29 = smov 64   ;;  %s2647_s30 = smov 4  }
   0x6   :  { %41 = dma.hbm_to_vmem [thread:$0]  %s34_s23, 3072, %s36_s25, [#allocation6], %s2646_s29, %s2646_s29, %s2647_s30  }
   0x7   :  { %s2648_s7 = smov [#allocation2]   ;;  %s48_s1 = sshll.u32 %s3259_s3, 4  ;;  %s49_s1 = int_to_ptr.hbm [resolvable:$true] %s48_s1 }
   0x8   :  { %s22_s8 = sshll.u32 %s2648_s7, 4  ;;  %s2649_s11 = smov [#allocation7]   ;;  %s23_s8 = int_to_ptr.vmem [resolvable:$true] %s22_s8 }
   0x9   :  { %28 = dma.hbm_to_vmem [thread:$0]  %s21_s28, 1024, %s23_s8, [#allocation3], %s2646_s29, %s2646_s29, %s2647_s30  }
   0xa   :  { %s50_s12 = sshll.u32 %s2649_s11, 4  ;;  %s51_s12 = int_to_ptr.vmem [resolvable:$true] %s50_s12 }
   0xb   :  { %56 = dma.hbm_to_vmem [thread:$0]  %s49_s1, 1024, %s51_s12, [#allocation6], %s2646_s29, %s2646_s29, %s2647_s30  }
   0xc   :  { %2637 = dma.done.wait [#allocation3], 1024  }
   0xd   :  { %2638 = vsyncadd [#allocation3], 4294966272 }
   0xe   :  { %2639 = dma.done.wait [#allocation6], 4096  }
   0xf   :  { %2640 = vsyncadd [#allocation6], 4294963200  ;;  %v2704_v0 = vld [vmem:[#allocation2 + $0x10] sm:$0xff]  ;;  %v2706_v1 = vld [vmem:[#allocation2 + $0x8] sm:$0xff]  ;;  %s2650_s0 = smov 32   ;;  %s2651_s3 = smov 96  }
  0x10   :  { %v2708_v2 = vld [vmem:[#allocation2] sm:$0xff]  ;;  %v143_v3 = vshrl.u32 %v2704_v0, 16  ;;  %v145_v4 = vshll.u32 %v2704_v0, 16  ;;  %v136_v5 = vshrl.u32 %v2706_v1, 16  ;;  %v138_v6 = vshll.u32 %v2706_v1, 16  ;;  %v2725_v16 = vld [vmem:[#allocation2 + $0x18] sm:$0xff] }
  0x11   :  { %v129_v7 = vshrl.u32 %v2708_v2, 16  ;;  %v131_v8 = vshll.u32 %v2708_v2, 16  ;;  %v2721_v15 = vld [vmem:[#allocation2 + $0x20] sm:$0xff]  ;;  %v202_v17 = vrot.slane %v2704_v0, 1  ;;  %v201_v19 = vrot.slane %v2706_v1, 1  ;;  %v2737_v26 = vld [vmem:[#allocation2 + $0x28] sm:$0xff] }
  0x12   :  { %v147_v9 = vrot.slane %v145_v4, 1  ;;  %v140_v10 = vrot.slane %v138_v6, 1  ;;  %v159_v18 = vshll.u32 %v2721_v15, 16  ;;  %v200_v20 = vrot.slane %v2708_v2, 1  ;;  %v2742_v31 = vld [vmem:[#allocation2 + $0x38] sm:$0xff]  ;;  %v2747_v34 = vld [vmem:[#allocation2 + $0x30] sm:$0xff] }
  0x13   :  { %v133_v11 = vrot.slane %v131_v8, 1  ;;  %v152_v21 = vshll.u32 %v2725_v16, 16  ;;  %v157_v22 = vshrl.u32 %v2721_v15, 16  ;;  %v150_v24 = vshrl.u32 %v2725_v16, 16  ;;  %s2230_s16 = sshll.u32 %s3261_s5, 4  ;;  %s2652_s17 = smov [#allocation8]   ;;  %s2231_s16 = int_to_ptr.hbm [resolvable:$true] %s2230_s16 }
  0x14   :  { %v148_v12 = vor.u32 %v147_v9, %v143_v3  ;;  %v141_v13 = vor.u32 %v140_v10, %v136_v5  ;;  %v161_v23 = vrot.slane %v159_v18, 1  ;;  %v203_v28 = vrot.slane %v2725_v16, 1  ;;  %s2228_s18 = sshll.u32 %s2652_s17, 4  ;;  %s2653_s21 = smov [#allocation9]   ;;  %s2229_s18 = int_to_ptr.vmem [resolvable:$true] %s2228_s18 }
  0x15   :  { %v134_v14 = vor.u32 %v133_v11, %v129_v7  ;;  %v154_v25 = vrot.slane %v152_v21, 1  ;;  %v166_v30 = vshll.u32 %v2737_v26, 16  ;;  %v164_v32 = vshrl.u32 %v2737_v26, 16  ;;  %v2470_v11 = vld [vmem:[#allocation5 + $0x20] sm:$0xff]  ;;  %s2239_s22 = sshll.u32 %s2653_s21, 4  ;;  %s2241_s25 = sshll.u32 %s3262_s6, 4  ;;  %s2240_s22 = int_to_ptr.vmem [resolvable:$true] %s2239_s22  ;;  %s2242_s25 = int_to_ptr.hbm [resolvable:$true] %s2241_s25 }
  0x16   :  { %188 = vrot.lane.b32.xlu2 %v148_v12, %s2650_s0  ;;  %186 = vrot.lane.b32.xlu1 %v141_v13, %s2650_s0  ;;  %v162_v27 = vor.u32 %v161_v23, %v157_v22  ;;  %v205_v35 = vrot.slane %v2737_v26, 1  ;;  %v180_v36 = vshll.u32 %v2742_v31, 16  ;;  %v204_v38 = vrot.slane %v2721_v15, 1  ;;  %v2469_v13 = vld [vmem:[#allocation5 + $0x18] sm:$0xff] }
  0x17   :  { %184 = vrot.lane.b32.xlu0 %v134_v14, %s2650_s0  ;;  %v155_v29 = vor.u32 %v154_v25, %v150_v24  ;;  %v168_v33 = vrot.slane %v166_v30, 1  ;;  %v173_v39 = vshll.u32 %v2747_v34, 16  ;;  %v178_v40 = vshrl.u32 %v2742_v31, 16  ;;  %v2468_v14 = vld [vmem:[#allocation5 + $0x10] sm:$0xff] }
  0x18   :  { %v182_v41 = vrot.slane %v180_v36, 1  ;;  %v171_v42 = vshrl.u32 %v2747_v34, 16  ;;  %v206_v45 = vrot.slane %v2747_v34, 1  ;;  %v757_v47 = vrot.slane %v136_v5, 1 }
  0x19   :  { %v169_v37 = vor.u32 %v168_v33, %v164_v32  ;;  %v175_v43 = vrot.slane %v173_v39, 1  ;;  %v758_v48 = vrot.slane %v138_v6, 2  ;;  %v754_v49 = vrot.slane %v129_v7, 1 }
  0x1a   :  { %v183_v44 = vor.u32 %v182_v41, %v178_v40  ;;  %v755_v50 = vrot.slane %v131_v8, 2  ;;  %v207_v53 = vrot.slane %v2742_v31, 1  ;;  %v766_v54 = vrot.slane %v157_v22, 1 }
  0x1b   :  { %v176_v46 = vor.u32 %v175_v43, %v171_v42  ;;  %v759_v51 = vor.u32 %v758_v48, %v757_v47  ;;  %v767_v55 = vrot.slane %v159_v18, 2  ;;  %v760_v56 = vrot.slane %v143_v3, 1 }
  0x1c   :  { %v756_v52 = vor.u32 %v755_v50, %v754_v49  ;;  %v763_v57 = vrot.slane %v150_v24, 1  ;;  %v764_v58 = vrot.slane %v152_v21, 2  ;;  %v761_v59 = vrot.slane %v145_v4, 2  ;;  %v2471_v4 = vld [vmem:[#allocation5 + $0x28] sm:$0xff] }
  0x1d   :  { %v768_v60 = vor.u32 %v767_v55, %v766_v54  ;;  %v769_v63 = vrot.slane %v164_v32, 1  ;;  %v770_v3 = vrot.slane %v166_v30, 2  ;;  %v772_v5 = vrot.slane %v171_v42, 1  ;;  %497 = vmatpush.bf16.msra.mxu0 %v2471_v4 }
  0x1e   :  { %212 = vrot.lane.b32.xlu2 %v202_v17, %s2646_s29  ;;  %210 = vrot.lane.b32.xlu1 %v201_v19, %s2646_s29  ;;  %v765_v61 = vor.u32 %v764_v58, %v763_v57  ;;  %v762_v62 = vor.u32 %v761_v59, %v760_v56  ;;  %v773_v6 = vrot.slane %v173_v39, 2  ;;  %v775_v9 = vrot.slane %v178_v40, 1  ;;  %v2467_v17 = vld [vmem:[#allocation5 + $0x8] sm:$0xff] }
  0x1f   :  { %208 = vrot.lane.b32.xlu0 %v200_v20, %s2646_s29  ;;  %v771_v7 = vor.u32 %v770_v3, %v769_v63  ;;  %v776_v10 = vrot.slane %v180_v36, 2  ;;  %v2466_v20 = vld [vmem:[#allocation5] sm:$0xff]  ;;  %vm224_vm0 = vcmask 261120   ;;  %vm241_vm1 = vcmask 523264  }
  0x20   :  { %v774_v8 = vor.u32 %v773_v6, %v772_v5  ;;  %vm480_vm2 = vcmask 785408   ;;  %vm1613_vm3 = vcmask 1043458   ;;  %vm1617_vm4 = vcmask 1045508  }
  0x21   :  { %v777_v12 = vor.u32 %v776_v10, %v775_v9  ;;  %498 = vmatpush.bf16.msra.mxu0 %v2470_v11  ;;  %vm1610_vm5 = vcmask 1041408   ;;  %vm689_vm6 = vcmask 1045504   ;;  %vm1501_vm7 = vcmask 1044480  }
  0x22   :  { %vm1977_vm8 = vcmask 1043456   ;;  %vm2079_vm9 = vcmask 1041409   ;;  %vm2082_vm10 = vcmask 1042434   ;;  %vm2085_vm11 = vcmask 1043459  }
  0x23   :  { %vm2088_vm12 = vcmask 1044484   ;;  %vm2091_vm13 = vcmask 1045509   ;;  %vm2094_vm14 = vcmask 1046534   ;;  %vm2097_vm15 = vcmask 1047559  }
  0x25   :  { %499 = vmatpush.bf16.msra.mxu0 %v2469_v13 }
  0x26   :  { %192 = vrot.lane.b32.xlu2 %v162_v27, %s2650_s0  ;;  %214 = vrot.lane.b32.xlu1 %v203_v28, %s2646_s29 }
  0x27   :  { %190 = vrot.lane.b32.xlu0 %v155_v29, %s2650_s0 }
  0x29   :  { %500 = vmatpush.bf16.msra.mxu0 %v2468_v14 }
  0x2d   :  { %501 = vmatpush.bf16.msra.mxu0 %v2467_v17 }
  0x2e   :  { %218 = vrot.lane.b32.xlu2 %v205_v35, %s2646_s29  ;;  %194 = vrot.lane.b32.xlu1 %v169_v37, %s2650_s0 }
  0x2f   :  { %216 = vrot.lane.b32.xlu0 %v204_v38, %s2646_s29 }
  0x31   :  { %502 = vmatpush.bf16.msra.mxu0 %v2466_v20 }
  0x36   :  { %198 = vrot.lane.b32.xlu2 %v183_v44, %s2650_s0  ;;  %220 = vrot.lane.b32.xlu1 %v206_v45, %s2646_s29 }
  0x37   :  { %196 = vrot.lane.b32.xlu0 %v176_v46, %s2650_s0 }
  0x3e   :  { %780 = vrot.lane.b32.xlu2 %v759_v51, %s2651_s3  ;;  %778 = vrot.lane.b32.xlu1 %v756_v52, %s2651_s3 }
  0x3f   :  { %222 = vrot.lane.b32.xlu0 %v207_v53, %s2646_s29 }
  0x46   :  { %786 = vrot.lane.b32.xlu2 %v768_v60, %s2651_s3  ;;  %784 = vrot.lane.b32.xlu1 %v765_v61, %s2651_s3 }
  0x47   :  { %782 = vrot.lane.b32.xlu0 %v762_v62, %s2651_s3 }
  0x4e   :  { %790 = vrot.lane.b32.xlu1 %v774_v8, %s2651_s3  ;;  %792 = vrot.lane.b32.xlu2 %v777_v12, %s2651_s3 }
  0x4f   :  { %788 = vrot.lane.b32.xlu0 %v771_v7, %s2651_s3 }
  0x70   :  { %v189_v33 = vpop.permute.xlu2 %188 }
  0x71   :  { %v230_v35 = vsel %vm224_vm0, %v2704_v0, %v189_v33 }
  0x78   :  { %v213_v37 = vpop.permute.xlu2 %212 }
  0x79   :  { %v2799_v40 = vsel %vm241_vm1, %v230_v35, %v213_v37 }
  0x7a   :  { %v290_v43 = vrot.slane %v2799_v40, 1  ;;  %v291_v47 = vrot.slane %v2799_v40, 2  ;;  %v292_v49 = vrot.slane %v2799_v40, 3  ;;  %v293_v52 = vrot.slane %v2799_v40, 4 }
  0x7b   :  { %v294_v53 = vrot.slane %v2799_v40, 5  ;;  %v295_v54 = vrot.slane %v2799_v40, 6 }
  0x80   :  { %v193_v56 = vpop.permute.xlu2 %192 }
  0x81   :  { %v234_v57 = vsel %vm224_vm0, %v2721_v15, %v193_v56 }
  0x88   :  { %v187_v18 = vpop.permute.xlu1 %186  ;;  %v219_v4 = vpop.permute.xlu2 %218 }
  0x89   :  { %v185_v19 = vpop.permute.xlu0 %184  ;;  %v228_v21 = vsel %vm224_vm0, %v2706_v1, %v187_v18 }
  0x8a   :  { %v226_v22 = vsel %vm224_vm0, %v2708_v2, %v185_v19 }
  0x90   :  { %v211_v23 = vpop.permute.xlu1 %210 }
  0x91   :  { %v209_v24 = vpop.permute.xlu0 %208  ;;  %v2781_v25 = vsel %vm241_vm1, %v228_v21, %v211_v23 }
  0x92   :  { %v2784_v27 = vsel %vm241_vm1, %v226_v22, %v209_v24  ;;  %346 = vst [vmem:[#allocation1 + $0x7] ss:$9 sm:$0xff] %v2781_v25  ;;  %v284_v36 = vrot.slane %v2781_v25, 1  ;;  %v285_v38 = vrot.slane %v2781_v25, 2  ;;  %v286_v41 = vrot.slane %v2781_v25, 3 }
  0x93   :  { %v278_v28 = vrot.slane %v2784_v27, 1  ;;  %v279_v29 = vrot.slane %v2784_v27, 2  ;;  %326 = vst [vmem:[#allocation1] ss:$9 sm:$0xff] %v2784_v27  ;;  %v280_v1 = vrot.slane %v2784_v27, 3  ;;  %v281_v2 = vrot.slane %v2784_v27, 4 }
  0x94   :  { %v282_v30 = vrot.slane %v2784_v27, 5  ;;  %v283_v32 = vrot.slane %v2784_v27, 6  ;;  %v287_v42 = vrot.slane %v2781_v25, 4  ;;  %v288_v0 = vrot.slane %v2781_v25, 5 }
  0x95   :  { %329 = vst [vmem:[#allocation1 + $0x1] ss:$9 sm:$0xff] %v278_v28  ;;  %v289_v44 = vrot.slane %v2781_v25, 6 }
  0x96   :  { %332 = vst [vmem:[#allocation1 + $0x2] ss:$9 sm:$0xff] %v279_v29 }
  0x97   :  { %335 = vst [vmem:[#allocation1 + $0x3] ss:$9 sm:$0xff] %v280_v1 }
  0x98   :  { %338 = vst [vmem:[#allocation1 + $0x4] ss:$9 sm:$0xff] %v281_v2  ;;  %v215_v48 = vpop.permute.xlu1 %214 }
  0x99   :  { %341 = vst [vmem:[#allocation1 + $0x5] ss:$9 sm:$0xff] %v282_v30  ;;  %v191_v45 = vpop.permute.xlu0 %190 }
  0x9a   :  { %344 = vst [vmem:[#allocation1 + $0x6] ss:$9 sm:$0xff] %v283_v32  ;;  %v232_v46 = vsel %vm224_vm0, %v2725_v16, %v191_v45  ;;  %v199_v32 = vpop.permute.xlu2 %198 }
  0x9b   :  { %v2813_v51 = vsel %vm241_vm1, %v232_v46, %v215_v48  ;;  %v240_v33 = vsel %vm224_vm0, %v2742_v31, %v199_v32  ;;  %v2479_v32 = vld [vmem:[#allocation5 + $0x68] sm:$0xff] }
  0x9c   :  { %v296_v16 = vrot.slane %v2813_v51, 1  ;;  %v297_v55 = vrot.slane %v2813_v51, 2  ;;  %v298_v58 = vrot.slane %v2813_v51, 3  ;;  %v299_v59 = vrot.slane %v2813_v51, 4  ;;  %1211 = vmatpush.bf16.msra.mxu1 %v2479_v32  ;;  %v2474_v32 = vld [vmem:[#allocation5 + $0x40] sm:$0xff] }
  0x9d   :  { %v300_v61 = vrot.slane %v2813_v51, 5  ;;  %v301_v63 = vrot.slane %v2813_v51, 6 }
  0xa0   :  { %v195_v7 = vpop.permute.xlu1 %194 }
  0xa1   :  { %v347_v39 = vld [vmem:[#allocation1] sm:$0xff]  ;;  %v217_v60 = vpop.permute.xlu0 %216  ;;  %v236_v8 = vsel %vm224_vm0, %v2737_v26, %v195_v7 }
  0xa2   :  { %349 = vst [vmem:[#allocation1] ss:$9 sm:$0xff] %v284_v36  ;;  %2313 = vmatmul.msk.bf16.vlgmr.msra.gmra.mxu0 %vm480_vm2, %v347_v39  ;;  %v2828_v62 = vsel %vm241_vm1, %v234_v57, %v217_v60  ;;  %v2840_v10 = vsel %vm241_vm1, %v236_v8, %v219_v4 }
  0xa3   :  { %351 = vst [vmem:[#allocation1 + $0x1] ss:$9 sm:$0xff] %v285_v38  ;;  %v302_v5 = vrot.slane %v2828_v62, 1  ;;  %v303_v15 = vrot.slane %v2828_v62, 2  ;;  %v304_v6 = vrot.slane %v2828_v62, 3  ;;  %v305_v9 = vrot.slane %v2828_v62, 4 }
  0xa4   :  { %353 = vst [vmem:[#allocation1 + $0x2] ss:$9 sm:$0xff] %v286_v41  ;;  %v306_v11 = vrot.slane %v2828_v62, 5  ;;  %v307_v12 = vrot.slane %v2828_v62, 6  ;;  %v308_v14 = vrot.slane %v2840_v10, 1  ;;  %v309_v17 = vrot.slane %v2840_v10, 2 }
  0xa5   :  { %355 = vst [vmem:[#allocation1 + $0x3] ss:$9 sm:$0xff] %v287_v42  ;;  %v310_v18 = vrot.slane %v2840_v10, 3  ;;  %v311_v26 = vrot.slane %v2840_v10, 4  ;;  %v312_v22 = vrot.slane %v2840_v10, 5  ;;  %v313_v24 = vrot.slane %v2840_v10, 6 }
  0xa6   :  { %357 = vst [vmem:[#allocation1 + $0x4] ss:$9 sm:$0xff] %v288_v0 }
  0xa7   :  { %359 = vst [vmem:[#allocation1 + $0x5] ss:$9 sm:$0xff] %v289_v44 }
  0xa8   :  { %360 = vst [vmem:[#allocation1 + $0x6] ss:$9 sm:$0xff] %v2799_v40  ;;  %v221_v21 = vpop.permute.xlu1 %220 }
  0xa9   :  { %362 = vst [vmem:[#allocation1 + $0x7] ss:$9 sm:$0xff] %v290_v43  ;;  %v197_v19 = vpop.permute.xlu0 %196 }
  0xaa   :  { %v238_v20 = vsel %vm224_vm0, %v2747_v34, %v197_v19 }
  0xab   :  { %v2854_v23 = vsel %vm241_vm1, %v238_v20, %v221_v21 }
  0xac   :  { %v314_v29 = vrot.slane %v2854_v23, 1  ;;  %v315_v1 = vrot.slane %v2854_v23, 2  ;;  %v316_v2 = vrot.slane %v2854_v23, 3  ;;  %v317_v30 = vrot.slane %v2854_v23, 4 }
  0xad   :  { %v318_v34 = vrot.slane %v2854_v23, 5  ;;  %v319_v37 = vrot.slane %v2854_v23, 6 }
  0xb0   :  { %v363_v50 = vld [vmem:[#allocation1] sm:$0xff] }
  0xb1   :  { %365 = vst [vmem:[#allocation1] ss:$9 sm:$0xff] %v291_v47  ;;  %v223_v35 = vpop.permute.xlu0 %222 }
  0xb2   :  { %367 = vst [vmem:[#allocation1 + $0x1] ss:$9 sm:$0xff] %v292_v49  ;;  %2314 = vmatmul.msk.bf16.gmra.mxu0 %vm480_vm2, %v363_v50  ;;  %v2867_v36 = vsel %vm241_vm1, %v240_v33, %v223_v35 }
  0xb3   :  { %369 = vst [vmem:[#allocation1 + $0x2] ss:$9 sm:$0xff] %v293_v52  ;;  %v320_v38 = vrot.slane %v2867_v36, 1  ;;  %v321_v41 = vrot.slane %v2867_v36, 2  ;;  %v322_v42 = vrot.slane %v2867_v36, 3  ;;  %v323_v0 = vrot.slane %v2867_v36, 4 }
  0xb4   :  { %371 = vst [vmem:[#allocation1 + $0x3] ss:$9 sm:$0xff] %v294_v53  ;;  %v324_v31 = vrot.slane %v2867_v36, 5  ;;  %v325_v43 = vrot.slane %v2867_v36, 6 }
  0xb5   :  { %373 = vst [vmem:[#allocation1 + $0x4] ss:$9 sm:$0xff] %v295_v54 }
  0xb6   :  { %374 = vst [vmem:[#allocation1 + $0x5] ss:$9 sm:$0xff] %v2813_v51 }
  0xb7   :  { %376 = vst [vmem:[#allocation1 + $0x6] ss:$9 sm:$0xff] %v296_v16 }
  0xb8   :  { %378 = vst [vmem:[#allocation1 + $0x7] ss:$9 sm:$0xff] %v297_v55 }
  0xbf   :  { %v379_v3 = vld [vmem:[#allocation1] sm:$0xff] }
  0xc0   :  { %381 = vst [vmem:[#allocation1] ss:$9 sm:$0xff] %v298_v58 }
  0xc1   :  { %383 = vst [vmem:[#allocation1 + $0x1] ss:$9 sm:$0xff] %v299_v59 }
  0xc2   :  { %385 = vst [vmem:[#allocation1 + $0x2] ss:$9 sm:$0xff] %v300_v61  ;;  %2315 = vmatmul.msk.bf16.gmra.mxu0 %vm480_vm2, %v379_v3 }
  0xc3   :  { %387 = vst [vmem:[#allocation1 + $0x3] ss:$9 sm:$0xff] %v301_v63 }
  0xc4   :  { %388 = vst [vmem:[#allocation1 + $0x4] ss:$9 sm:$0xff] %v2828_v62 }
  0xc5   :  { %390 = vst [vmem:[#allocation1 + $0x5] ss:$9 sm:$0xff] %v302_v5 }
  0xc6   :  { %392 = vst [vmem:[#allocation1 + $0x6] ss:$9 sm:$0xff] %v303_v15 }
  0xc7   :  { %394 = vst [vmem:[#allocation1 + $0x7] ss:$9 sm:$0xff] %v304_v6 }
  0xce   :  { %v395_v13 = vld [vmem:[#allocation1] sm:$0xff] }
  0xcf   :  { %397 = vst [vmem:[#allocation1] ss:$9 sm:$0xff] %v305_v9 }
  0xd0   :  { %399 = vst [vmem:[#allocation1 + $0x1] ss:$9 sm:$0xff] %v306_v11 }
  0xd1   :  { %401 = vst [vmem:[#allocation1 + $0x2] ss:$9 sm:$0xff] %v307_v12 }
  0xd2   :  { %402 = vst [vmem:[#allocation1 + $0x3] ss:$9 sm:$0xff] %v2840_v10  ;;  %2316 = vmatmul.msk.bf16.gmra.mxu0 %vm480_vm2, %v395_v13 }
  0xd3   :  { %404 = vst [vmem:[#allocation1 + $0x4] ss:$9 sm:$0xff] %v308_v14 }
  0xd4   :  { %406 = vst [vmem:[#allocation1 + $0x5] ss:$9 sm:$0xff] %v309_v17 }
  0xd5   :  { %408 = vst [vmem:[#allocation1 + $0x6] ss:$9 sm:$0xff] %v310_v18 }
  0xd6   :  { %410 = vst [vmem:[#allocation1 + $0x7] ss:$9 sm:$0xff] %v311_v26 }
  0xdd   :  { %v411_v28 = vld [vmem:[#allocation1] sm:$0xff] }
  0xde   :  { %413 = vst [vmem:[#allocation1] ss:$9 sm:$0xff] %v312_v22 }
  0xdf   :  { %415 = vst [vmem:[#allocation1 + $0x1] ss:$9 sm:$0xff] %v313_v24 }
  0xe0   :  { %416 = vst [vmem:[#allocation1 + $0x2] ss:$9 sm:$0xff] %v2854_v23 }
  0xe1   :  { %418 = vst [vmem:[#allocation1 + $0x3] ss:$9 sm:$0xff] %v314_v29 }
  0xe2   :  { %420 = vst [vmem:[#allocation1 + $0x4] ss:$9 sm:$0xff] %v315_v1  ;;  %2317 = vmatmul.msk.bf16.gmra.mxu0 %vm480_vm2, %v411_v28 }
  0xe3   :  { %422 = vst [vmem:[#allocation1 + $0x5] ss:$9 sm:$0xff] %v316_v2 }
  0xe4   :  { %424 = vst [vmem:[#allocation1 + $0x6] ss:$9 sm:$0xff] %v317_v30 }
  0xe5   :  { %426 = vst [vmem:[#allocation1 + $0x7] ss:$9 sm:$0xff] %v318_v34 }
  0xec   :  { %v427_v39 = vld [vmem:[#allocation1] sm:$0xff] }
  0xed   :  { %429 = vst [vmem:[#allocation1] ss:$9 sm:$0xff] %v319_v37  ;;  %v2478_v37 = vld [vmem:[#allocation5 + $0x60] sm:$0xff] }
  0xee   :  { %430 = vst [vmem:[#allocation1 + $0x1] ss:$9 sm:$0xff] %v2867_v36  ;;  %1212 = vmatpush.bf16.msra.mxu1 %v2478_v37 }
  0xef   :  { %432 = vst [vmem:[#allocation1 + $0x2] ss:$9 sm:$0xff] %v320_v38 }
  0xf0   :  { %434 = vst [vmem:[#allocation1 + $0x3] ss:$9 sm:$0xff] %v321_v41 }
  0xf1   :  { %436 = vst [vmem:[#allocation1 + $0x4] ss:$9 sm:$0xff] %v322_v42  ;;  %v2477_v42 = vld [vmem:[#allocation5 + $0x58] sm:$0xff] }
  0xf2   :  { %438 = vst [vmem:[#allocation1 + $0x5] ss:$9 sm:$0xff] %v323_v0  ;;  %2318 = vmatmul.msk.bf16.gmra.mxu0 %vm480_vm2, %v427_v39  ;;  %1213 = vmatpush.bf16.msra.mxu1 %v2477_v42  ;;  %v2473_v42 = vld [vmem:[#allocation5 + $0x38] sm:$0xff] }
  0xf3   :  { %440 = vst [vmem:[#allocation1 + $0x6] ss:$9 sm:$0xff] %v324_v31 }
  0xf4   :  { %442 = vst [vmem:[#allocation1 + $0x7] ss:$9 sm:$0xff] %v325_v43 }
  0xfb   :  { %v443_v44 = vld [vmem:[#allocation1] sm:$0xff] }
 0x102   :  { %2319 = vmatmul.msk.bf16.gmra.mxu0 %vm480_vm2, %v443_v44 }
 0x11f   :  { %v504_v45 = vpop.f32.mrf.mxu0 }
 0x120   :  { %v553_v46 = vrot.slane %v504_v45, 2  ;;  %v554_v47 = vrot.slane %v504_v45, 4  ;;  %v555_v48 = vrot.slane %v504_v45, 6  ;;  %595 = vst [vmem:[#allocation1] ss:$4 sm:$0xff] %v504_v45 }
 0x122   :  { %597 = vst [vmem:[#allocation1 + $0x1] ss:$4 sm:$0xff] %v553_v46 }
 0x123   :  { %599 = vst [vmem:[#allocation1 + $0x2] ss:$4 sm:$0xff] %v554_v47 }
 0x124   :  { %601 = vst [vmem:[#allocation1 + $0x3] ss:$4 sm:$0xff] %v555_v48 }
 0x127   :  { %v506_v49 = vpop.f32.mrf.mxu0 }
 0x128   :  { %v556_v50 = vrot.slane %v506_v49, 2  ;;  %v557_v52 = vrot.slane %v506_v49, 4  ;;  %v558_v53 = vrot.slane %v506_v49, 6  ;;  %603 = vst [vmem:[#allocation1 + $0x20] ss:$4 sm:$0xff] %v506_v49 }
 0x12a   :  { %605 = vst [vmem:[#allocation1 + $0x21] ss:$4 sm:$0xff] %v556_v50 }
 0x12b   :  { %v2879_v54 = vld.sshfl [vmem:[#allocation1] sm:$0xff pattern:$0x73625140]  ;;  %607 = vst [vmem:[#allocation1 + $0x22] ss:$4 sm:$0xff] %v557_v52 }
 0x12c   :  { %610 = vst [vmem:[#allocation1] ss:$4 sm:$0xff] %v558_v53 }
 0x12f   :  { %v509_v16 = vpop.f32.mrf.mxu0 }
 0x130   :  { %v559_v55 = vrot.slane %v509_v16, 2  ;;  %v560_v56 = vrot.slane %v509_v16, 4  ;;  %v561_v57 = vrot.slane %v509_v16, 6  ;;  %611 = vst [vmem:[#allocation1 + $0x1] ss:$4 sm:$0xff] %v509_v16 }
 0x132   :  { %v2881_v58 = vld.sshfl [vmem:[#allocation1 + $0x20] sm:$0xff pattern:$0x73625140]  ;;  %612 = vst [vmem:[#allocation1 + $0x2] ss:$4 sm:$0xff] %v559_v55 }
 0x133   :  { %613 = vst [vmem:[#allocation1 + $0x3] ss:$4 sm:$0xff] %v560_v56 }
 0x134   :  { %614 = vst [vmem:[#allocation1 + $0x20] ss:$4 sm:$0xff] %v561_v57 }
 0x137   :  { %v511_v59 = vpop.f32.mrf.mxu0 }
 0x138   :  { %v562_v60 = vrot.slane %v511_v59, 2  ;;  %v563_v61 = vrot.slane %v511_v59, 4  ;;  %v564_v63 = vrot.slane %v511_v59, 6  ;;  %615 = vst [vmem:[#allocation1 + $0x21] ss:$4 sm:$0xff] %v511_v59 }
 0x13a   :  { %v2883_v3 = vld.sshfl [vmem:[#allocation1] sm:$0xff pattern:$0x73625140]  ;;  %616 = vst [vmem:[#allocation1 + $0x22] ss:$4 sm:$0xff] %v562_v60  ;;  %v779_v60 = vpop.permute.xlu1 %778 }
 0x13b   :  { %619 = vst [vmem:[#allocation1] ss:$4 sm:$0xff] %v563_v61 }
 0x13c   :  { %620 = vst [vmem:[#allocation1 + $0x1] ss:$4 sm:$0xff] %v564_v63 }
 0x13f   :  { %v514_v5 = vpop.f32.mrf.mxu0 }
 0x140   :  { %v565_v15 = vrot.slane %v514_v5, 2  ;;  %v566_v6 = vrot.slane %v514_v5, 4  ;;  %v567_v7 = vrot.slane %v514_v5, 6  ;;  %621 = vst [vmem:[#allocation1 + $0x2] ss:$4 sm:$0xff] %v514_v5 }
 0x141   :  { %v2885_v8 = vld.sshfl [vmem:[#allocation1 + $0x20] sm:$0xff pattern:$0x73625140] }
 0x142   :  { %622 = vst [vmem:[#allocation1 + $0x3] ss:$4 sm:$0xff] %v565_v15 }
 0x143   :  { %623 = vst [vmem:[#allocation1 + $0x20] ss:$4 sm:$0xff] %v566_v6  ;;  %v2909_v6 = vsel %vm480_vm2, %v2784_v27, %v779_v60  ;;  %v2476_v27 = vld [vmem:[#allocation5 + $0x50] sm:$0xff] }
 0x144   :  { %624 = vst [vmem:[#allocation1 + $0x21] ss:$4 sm:$0xff] %v567_v7  ;;  %v781_v7 = vpop.permute.xlu2 %780  ;;  %1214 = vmatpush.bf16.msra.mxu1 %v2476_v27 }
 0x147   :  { %v516_v4 = vpop.f32.mrf.mxu0 }
 0x148   :  { %v568_v9 = vrot.slane %v516_v4, 2  ;;  %v569_v11 = vrot.slane %v516_v4, 4  ;;  %v570_v12 = vrot.slane %v516_v4, 6  ;;  %625 = vst [vmem:[#allocation1 + $0x22] ss:$4 sm:$0xff] %v516_v4  ;;  %v837_v4 = vrot.slane %v2909_v6, 4 }
 0x149   :  { %v2887_v13 = vld.sshfl [vmem:[#allocation1] sm:$0xff pattern:$0x73625140] }
 0x14a   :  { %628 = vst [vmem:[#allocation1] ss:$4 sm:$0xff] %v568_v9 }
 0x14b   :  { %629 = vst [vmem:[#allocation1 + $0x1] ss:$4 sm:$0xff] %v569_v11  ;;  %v2916_v11 = vsel %vm480_vm2, %v2781_v25, %v781_v7  ;;  %v838_v25 = vrot.slane %v2909_v6, 5 }
 0x14c   :  { %630 = vst [vmem:[#allocation1 + $0x2] ss:$4 sm:$0xff] %v570_v12  ;;  %v834_v12 = vrot.slane %v2909_v6, 1 }
 0x14f   :  { %v519_v14 = vpop.f32.mrf.mxu0  ;;  %v2889_v19 = vld.sshfl [vmem:[#allocation1 + $0x20] sm:$0xff pattern:$0x73625140] }
 0x150   :  { %v571_v17 = vrot.slane %v519_v14, 2  ;;  %v572_v18 = vrot.slane %v519_v14, 4  ;;  %v573_v26 = vrot.slane %v519_v14, 6  ;;  %631 = vst [vmem:[#allocation1 + $0x3] ss:$4 sm:$0xff] %v519_v14  ;;  %v839_v14 = vrot.slane %v2909_v6, 6 }
 0x152   :  { %632 = vst [vmem:[#allocation1 + $0x20] ss:$4 sm:$0xff] %v571_v17 }
 0x153   :  { %633 = vst [vmem:[#allocation1 + $0x21] ss:$4 sm:$0xff] %v572_v18  ;;  %v840_v18 = vrot.slane %v2916_v11, 1 }
 0x154   :  { %634 = vst [vmem:[#allocation1 + $0x22] ss:$4 sm:$0xff] %v573_v26  ;;  %v896_v26 = vunpack.i.h.s16 %v2916_v11 }
 0x155   :  { %v898_v37 = vunpack.i.h.s16 %v840_v18 }
 0x157   :  { %v2891_v20 = vld.sshfl [vmem:[#allocation1] sm:$0xff pattern:$0x73625140]  ;;  %v521_v21 = vpop.f32.mrf.mxu0 }
 0x158   :  { %v574_v22 = vrot.slane %v521_v21, 2  ;;  %v575_v24 = vrot.slane %v521_v21, 4  ;;  %v576_v28 = vrot.slane %v521_v21, 6  ;;  %637 = vst [vmem:[#allocation1] ss:$4 sm:$0xff] %v521_v21  ;;  %v835_v21 = vrot.slane %v2909_v6, 2 }
 0x15a   :  { %638 = vst [vmem:[#allocation1 + $0x1] ss:$4 sm:$0xff] %v574_v22  ;;  %v836_v22 = vrot.slane %v2909_v6, 3 }
 0x15b   :  { %639 = vst [vmem:[#allocation1 + $0x2] ss:$4 sm:$0xff] %v575_v24  ;;  %v2893_v29 = vld.sshfl [vmem:[#allocation1 + $0x20] sm:$0xff pattern:$0x73625140]  ;;  %v2320_v24 = vpack.i.b16 %v2916_v11, %v839_v14 }
 0x15c   :  { %640 = vst [vmem:[#allocation1 + $0x3] ss:$4 sm:$0xff] %v576_v28  ;;  %v2475_v28 = vld [vmem:[#allocation5 + $0x48] sm:$0xff] }
 0x15d   :  { %1215 = vmatpush.bf16.msra.mxu1 %v2475_v28 }
 0x15f   :  { %v524_v1 = vpop.f32.mrf.mxu0 }
 0x160   :  { %v577_v2 = vrot.slane %v524_v1, 2  ;;  %v578_v30 = vrot.slane %v524_v1, 4  ;;  %v579_v34 = vrot.slane %v524_v1, 6  ;;  %641 = vst [vmem:[#allocation1 + $0x20] ss:$4 sm:$0xff] %v524_v1  ;;  %v2321_v1 = vpack.i.b16 %v840_v18, %v896_v26 }
 0x161   :  { %1216 = vmatpush.bf16.msra.mxu1 %v2474_v32 }
 0x162   :  { %642 = vst [vmem:[#allocation1 + $0x21] ss:$4 sm:$0xff] %v577_v2  ;;  %v841_v2 = vrot.slane %v2916_v11, 2 }
 0x163   :  { %v2895_v33 = vld.sshfl [vmem:[#allocation1] sm:$0xff pattern:$0x73625140]  ;;  %643 = vst [vmem:[#allocation1 + $0x22] ss:$4 sm:$0xff] %v578_v30  ;;  %v842_v30 = vrot.slane %v2916_v11, 3 }
 0x164   :  { %646 = vst [vmem:[#allocation1] ss:$4 sm:$0xff] %v579_v34  ;;  %v843_v34 = vrot.slane %v2916_v11, 4 }
 0x165   :  { %1217 = vmatpush.bf16.msra.mxu1 %v2473_v42 }
 0x167   :  { %v526_v35 = vpop.f32.mrf.mxu0 }
 0x168   :  { %v580_v38 = vrot.slane %v526_v35, 2  ;;  %v581_v39 = vrot.slane %v526_v35, 4  ;;  %v582_v41 = vrot.slane %v526_v35, 6  ;;  %647 = vst [vmem:[#allocation1 + $0x1] ss:$4 sm:$0xff] %v526_v35  ;;  %v844_v35 = vrot.slane %v2916_v11, 5 }
 0x16a   :  { %v2897_v0 = vld.sshfl [vmem:[#allocation1 + $0x20] sm:$0xff pattern:$0x73625140]  ;;  %648 = vst [vmem:[#allocation1 + $0x2] ss:$4 sm:$0xff] %v580_v38  ;;  %v900_v38 = vunpack.i.h.s16 %v841_v2 }
 0x16b   :  { %649 = vst [vmem:[#allocation1 + $0x3] ss:$4 sm:$0xff] %v581_v39  ;;  %v902_v39 = vunpack.i.h.s16 %v842_v30 }
 0x16c   :  { %650 = vst [vmem:[#allocation1 + $0x20] ss:$4 sm:$0xff] %v582_v41  ;;  %v904_v41 = vunpack.i.h.s16 %v843_v34 }
 0x16f   :  { %v529_v31 = vpop.f32.mrf.mxu0 }
 0x170   :  { %v583_v43 = vrot.slane %v529_v31, 2  ;;  %v584_v44 = vrot.slane %v529_v31, 4  ;;  %v585_v45 = vrot.slane %v529_v31, 6  ;;  %651 = vst [vmem:[#allocation1 + $0x21] ss:$4 sm:$0xff] %v529_v31  ;;  %v906_v31 = vunpack.i.h.s16 %v844_v35 }
 0x172   :  { %v2899_v46 = vld.sshfl [vmem:[#allocation1] sm:$0xff pattern:$0x73625140]  ;;  %652 = vst [vmem:[#allocation1 + $0x22] ss:$4 sm:$0xff] %v583_v43  ;;  %v2322_v43 = vpack.i.b16 %v841_v2, %v898_v37 }
 0x173   :  { %655 = vst [vmem:[#allocation1] ss:$4 sm:$0xff] %v584_v44  ;;  %v783_v44 = vpop.permute.xlu0 %782 }
 0x174   :  { %656 = vst [vmem:[#allocation1 + $0x1] ss:$4 sm:$0xff] %v585_v45  ;;  %v2323_v45 = vpack.i.b16 %v842_v30, %v900_v38 }
 0x177   :  { %v531_v47 = vpop.f32.mrf.mxu0 }
 0x178   :  { %v586_v48 = vrot.slane %v531_v47, 2  ;;  %v587_v49 = vrot.slane %v531_v47, 4  ;;  %v588_v50 = vrot.slane %v531_v47, 6  ;;  %657 = vst [vmem:[#allocation1 + $0x2] ss:$4 sm:$0xff] %v531_v47 }
 0x179   :  { %v2901_v52 = vld.sshfl [vmem:[#allocation1 + $0x20] sm:$0xff pattern:$0x73625140] }
 0x17a   :  { %658 = vst [vmem:[#allocation1 + $0x3] ss:$4 sm:$0xff] %v586_v48  ;;  %v845_v48 = vrot.slane %v2916_v11, 6 }
 0x17b   :  { %659 = vst [vmem:[#allocation1 + $0x20] ss:$4 sm:$0xff] %v587_v49  ;;  %v2324_v49 = vpack.i.b16 %v843_v34, %v902_v39 }
 0x17c   :  { %660 = vst [vmem:[#allocation1 + $0x21] ss:$4 sm:$0xff] %v588_v50  ;;  %v2325_v50 = vpack.i.b16 %v844_v35, %v904_v41  ;;  %v787_v35 = vpop.permute.xlu2 %786 }
 0x17d   :  { %v2959_v39 = vsel %vm480_vm2, %v2828_v62, %v787_v35 }
 0x17e   :  { %v862_v62 = vrot.slane %v2959_v39, 5 }
 0x17f   :  { %v534_v53 = vpop.f32.mrf.mxu0 }
 0x180   :  { %v589_v16 = vrot.slane %v534_v53, 2  ;;  %v590_v55 = vrot.slane %v534_v53, 4  ;;  %v591_v56 = vrot.slane %v534_v53, 6  ;;  %661 = vst [vmem:[#allocation1 + $0x22] ss:$4 sm:$0xff] %v534_v53  ;;  %v2936_v53 = vsel %vm480_vm2, %v2799_v40, %v783_v44 }
 0x181   :  { %v2903_v57 = vld.sshfl [vmem:[#allocation1] sm:$0xff pattern:$0x73625140]  ;;  %v847_v60 = vrot.slane %v2936_v53, 2  ;;  %v851_v7 = vrot.slane %v2936_v53, 6  ;;  %v849_v27 = vrot.slane %v2936_v53, 4 }
 0x182   :  { %664 = vst [vmem:[#allocation1] ss:$4 sm:$0xff] %v589_v16  ;;  %v2472_v16 = vld [vmem:[#allocation5 + $0x30] sm:$0xff]  ;;  %v860_v44 = vrot.slane %v2959_v39, 3 }
 0x183   :  { %665 = vst [vmem:[#allocation1 + $0x1] ss:$4 sm:$0xff] %v590_v55  ;;  %v2326_v55 = vpack.i.b16 %v845_v48, %v906_v31  ;;  %1218 = vmatpush.bf16.msra.mxu1 %v2472_v16  ;;  %v858_v31 = vrot.slane %v2959_v39, 1  ;;  %v863_v16 = vrot.slane %v2959_v39, 6 }
 0x184   :  { %666 = vst [vmem:[#allocation1 + $0x2] ss:$4 sm:$0xff] %v591_v56  ;;  %v785_v56 = vpop.permute.xlu1 %784 }
 0x185   :  { %v2943_v40 = vsel %vm480_vm2, %v2813_v51, %v785_v56  ;;  %v850_v51 = vrot.slane %v2936_v53, 5 }
 0x186   :  { %v856_v30 = vrot.slane %v2943_v40, 5  ;;  %v857_v37 = vrot.slane %v2943_v40, 6 }
 0x187   :  { %v536_v59 = vpop.f32.mrf.mxu0  ;;  %v2905_v15 = vld.sshfl [vmem:[#allocation1 + $0x20] sm:$0xff pattern:$0x73625140] }
 0x188   :  { %v592_v61 = vrot.slane %v536_v59, 2  ;;  %v593_v63 = vrot.slane %v536_v59, 4  ;;  %v594_v5 = vrot.slane %v536_v59, 6  ;;  %667 = vst [vmem:[#allocation1 + $0x3] ss:$4 sm:$0xff] %v536_v59  ;;  %v846_v59 = vrot.slane %v2936_v53, 1 }
 0x189   :  { %v932_v32 = vunpack.i.h.s16 %v856_v30 }
 0x18a   :  { %668 = vst [vmem:[#allocation1 + $0x20] ss:$4 sm:$0xff] %v592_v61  ;;  %v852_v61 = vrot.slane %v2943_v40, 1 }
 0x18b   :  { %669 = vst [vmem:[#allocation1 + $0x21] ss:$4 sm:$0xff] %v593_v63  ;;  %v853_v63 = vrot.slane %v2943_v40, 2  ;;  %v2333_v41 = vpack.i.b16 %v857_v37, %v932_v32 }
 0x18c   :  { %670 = vst [vmem:[#allocation1 + $0x22] ss:$4 sm:$0xff] %v594_v5  ;;  %v854_v5 = vrot.slane %v2943_v40, 3  ;;  %v924_v14 = vunpack.i.h.s16 %v852_v61 }
 0x18d   :  { %v926_v26 = vunpack.i.h.s16 %v853_v63 }
 0x18e   :  { %v2329_v28 = vpack.i.b16 %v853_v63, %v924_v14 }
 0x18f   :  { %v2912_v9 = vld.sshfl [vmem:[#allocation1] sm:$0xff pattern:$0x73625140] }
 0x190   :  { %1051 = vst [vmem:[#allocation1 + $0x4] ss:$9 sm:$0xff] %v837_v4  ;;  %v922_v4 = vunpack.i.h.s16 %v2943_v40 }
 0x193   :  { %v2920_v17 = vld.sshfl [vmem:[#allocation1 + $0x20] sm:$0xff pattern:$0x73625140] }
 0x194   :  { %1039 = vst [vmem:[#allocation1] ss:$9 sm:$0xff] %v2909_v6 }
 0x195   :  { %1042 = vst [vmem:[#allocation1 + $0x1] ss:$9 sm:$0xff] %v834_v12  ;;  %v848_v12 = vrot.slane %v2936_v53, 3 }
 0x196   :  { %1045 = vst [vmem:[#allocation1 + $0x2] ss:$9 sm:$0xff] %v835_v21  ;;  %v928_v21 = vunpack.i.h.s16 %v854_v5 }
 0x197   :  { %1048 = vst [vmem:[#allocation1 + $0x3] ss:$9 sm:$0xff] %v836_v22  ;;  %v2327_v22 = vpack.i.b16 %v2943_v40, %v851_v7 }
 0x198   :  { %1054 = vst [vmem:[#allocation1 + $0x5] ss:$9 sm:$0xff] %v838_v25  ;;  %v2328_v25 = vpack.i.b16 %v852_v61, %v922_v4 }
 0x199   :  { %1057 = vst [vmem:[#allocation1 + $0x6] ss:$9 sm:$0xff] %v2320_v24  ;;  %v855_v24 = vrot.slane %v2943_v40, 4 }
 0x19a   :  { %1060 = vst [vmem:[#allocation1 + $0x7] ss:$9 sm:$0xff] %v2321_v1  ;;  %v2330_v1 = vpack.i.b16 %v854_v5, %v926_v26 }
 0x19b   :  { %v2331_v2 = vpack.i.b16 %v855_v24, %v928_v21  ;;  %v930_v34 = vunpack.i.h.s16 %v855_v24 }
 0x19d   :  { %v2332_v38 = vpack.i.b16 %v856_v30, %v930_v34 }
 0x1a1   :  { %v1061_v47 = vld [vmem:[#allocation1] sm:$0xff] }
 0x1a2   :  { %1063 = vst [vmem:[#allocation1] ss:$9 sm:$0xff] %v2322_v43  ;;  %1219 = vmatmul.bf16.vlgmr.msra.gmra.mxu1 %v1061_v47  ;;  %v859_v43 = vrot.slane %v2959_v39, 2  ;;  %v861_v47 = vrot.slane %v2959_v39, 4 }
 0x1a3   :  { %1065 = vst [vmem:[#allocation1 + $0x1] ss:$9 sm:$0xff] %v2323_v45  ;;  %v789_v45 = vpop.permute.xlu0 %788 }
 0x1a4   :  { %1067 = vst [vmem:[#allocation1 + $0x2] ss:$9 sm:$0xff] %v2324_v49  ;;  %v2969_v48 = vsel %vm480_vm2, %v2840_v10, %v789_v45 }
 0x1a5   :  { %1069 = vst [vmem:[#allocation1 + $0x3] ss:$9 sm:$0xff] %v2325_v50  ;;  %v864_v49 = vrot.slane %v2969_v48, 1  ;;  %v865_v50 = vrot.slane %v2969_v48, 2  ;;  %v867_v56 = vrot.slane %v2969_v48, 4  ;;  %v2334_v5 = vpack.i.b16 %v2969_v48, %v863_v16 }
 0x1a6   :  { %1071 = vst [vmem:[#allocation1 + $0x4] ss:$9 sm:$0xff] %v2326_v55  ;;  %v866_v55 = vrot.slane %v2969_v48, 3  ;;  %v869_v14 = vrot.slane %v2969_v48, 6 }
 0x1a7   :  { %1073 = vst [vmem:[#allocation1 + $0x5] ss:$9 sm:$0xff] %v2936_v53  ;;  %v950_v61 = vunpack.i.h.s16 %v864_v49  ;;  %v952_v10 = vunpack.i.h.s16 %v865_v50  ;;  %v956_v7 = vunpack.i.h.s16 %v867_v56 }
 0x1a8   :  { %1075 = vst [vmem:[#allocation1 + $0x6] ss:$9 sm:$0xff] %v846_v59  ;;  %v948_v59 = vunpack.i.h.s16 %v2969_v48  ;;  %v954_v63 = vunpack.i.h.s16 %v866_v55 }
 0x1a9   :  { %1077 = vst [vmem:[#allocation1 + $0x7] ss:$9 sm:$0xff] %v847_v60  ;;  %v868_v60 = vrot.slane %v2969_v48, 5  ;;  %v2337_v26 = vpack.i.b16 %v866_v55, %v952_v10 }
 0x1aa   :  { %v2335_v4 = vpack.i.b16 %v864_v49, %v948_v59 }
 0x1ab   :  { %v2339_v21 = vpack.i.b16 %v868_v60, %v956_v7 }
 0x1b0   :  { %v1078_v18 = vld [vmem:[#allocation1] sm:$0xff] }
 0x1b1   :  { %1080 = vst [vmem:[#allocation1] ss:$9 sm:$0xff] %v848_v12 }
 0x1b2   :  { %1082 = vst [vmem:[#allocation1 + $0x1] ss:$9 sm:$0xff] %v849_v27  ;;  %1224 = vmatmul.bf16.gmra.mxu1 %v1078_v18  ;;  %v958_v27 = vunpack.i.h.s16 %v868_v60  ;;  %v2336_v18 = vpack.i.b16 %v865_v50, %v950_v61 }
 0x1b3   :  { %1084 = vst [vmem:[#allocation1 + $0x2] ss:$9 sm:$0xff] %v850_v51  ;;  %v2338_v51 = vpack.i.b16 %v867_v56, %v954_v63 }
 0x1b4   :  { %1086 = vst [vmem:[#allocation1 + $0x3] ss:$9 sm:$0xff] %v2327_v22  ;;  %v791_v22 = vpop.permute.xlu1 %790 }
 0x1b5   :  { %1088 = vst [vmem:[#allocation1 + $0x4] ss:$9 sm:$0xff] %v2328_v25  ;;  %v2340_v25 = vpack.i.b16 %v869_v14, %v958_v27  ;;  %v2982_v24 = vsel %vm480_vm2, %v2854_v23, %v791_v22 }
 0x1b6   :  { %1090 = vst [vmem:[#allocation1 + $0x5] ss:$9 sm:$0xff] %v2329_v28  ;;  %v793_v28 = vpop.permute.xlu2 %792  ;;  %v870_v30 = vrot.slane %v2982_v24, 1  ;;  %v871_v34 = vrot.slane %v2982_v24, 2  ;;  %v875_v32 = vrot.slane %v2982_v24, 6  ;;  %v872_v23 = vrot.slane %v2982_v24, 3 }
 0x1b7   :  { %1092 = vst [vmem:[#allocation1 + $0x6] ss:$9 sm:$0xff] %v2330_v1  ;;  %v2987_v1 = vsel %vm480_vm2, %v2867_v36, %v793_v28  ;;  %v874_v36 = vrot.slane %v2982_v24, 5 }
 0x1b8   :  { %1094 = vst [vmem:[#allocation1 + $0x7] ss:$9 sm:$0xff] %v2331_v2  ;;  %v876_v2 = vrot.slane %v2987_v1, 1  ;;  %v974_v37 = vunpack.i.h.s16 %v2987_v1  ;;  %v878_v45 = vrot.slane %v2987_v1, 3  ;;  %v881_v55 = vrot.slane %v2987_v1, 6 }
 0x1ba   :  { %v980_v50 = vunpack.i.h.s16 %v878_v45 }
 0x1bf   :  { %v1095_v42 = vld [vmem:[#allocation1] sm:$0xff] }
 0x1c0   :  { %1097 = vst [vmem:[#allocation1] ss:$9 sm:$0xff] %v2332_v38  ;;  %v873_v38 = vrot.slane %v2982_v24, 4 }
 0x1c1   :  { %1099 = vst [vmem:[#allocation1 + $0x1] ss:$9 sm:$0xff] %v2333_v41  ;;  %v976_v41 = vunpack.i.h.s16 %v876_v2 }
 0x1c2   :  { %1101 = vst [vmem:[#allocation1 + $0x2] ss:$9 sm:$0xff] %v2959_v39  ;;  %1229 = vmatmul.bf16.gmra.mxu1 %v1095_v42  ;;  %v877_v42 = vrot.slane %v2987_v1, 2 }
 0x1c3   :  { %1103 = vst [vmem:[#allocation1 + $0x3] ss:$9 sm:$0xff] %v858_v31  ;;  %v2341_v31 = vpack.i.b16 %v2987_v1, %v875_v32 }
 0x1c4   :  { %1105 = vst [vmem:[#allocation1 + $0x4] ss:$9 sm:$0xff] %v859_v43  ;;  %v2342_v43 = vpack.i.b16 %v876_v2, %v974_v37  ;;  %v978_v49 = vunpack.i.h.s16 %v877_v42 }
 0x1c5   :  { %1107 = vst [vmem:[#allocation1 + $0x5] ss:$9 sm:$0xff] %v860_v44  ;;  %v2343_v44 = vpack.i.b16 %v877_v42, %v976_v41 }
 0x1c6   :  { %1109 = vst [vmem:[#allocation1 + $0x6] ss:$9 sm:$0xff] %v861_v47  ;;  %v879_v47 = vrot.slane %v2987_v1, 4  ;;  %v2344_v59 = vpack.i.b16 %v878_v45, %v978_v49 }
 0x1c7   :  { %1111 = vst [vmem:[#allocation1 + $0x7] ss:$9 sm:$0xff] %v862_v62  ;;  %v880_v62 = vrot.slane %v2987_v1, 5 }
 0x1c8   :  { %v982_v16 = vunpack.i.h.s16 %v879_v47  ;;  %v2345_v60 = vpack.i.b16 %v879_v47, %v980_v50 }
 0x1c9   :  { %v984_v56 = vunpack.i.h.s16 %v880_v62 }
 0x1ca   :  { %v2346_v10 = vpack.i.b16 %v880_v62, %v982_v16 }
 0x1cb   :  { %v2347_v63 = vpack.i.b16 %v881_v55, %v984_v56 }
 0x1ce   :  { %v1112_v12 = vld [vmem:[#allocation1] sm:$0xff] }
 0x1cf   :  { %1114 = vst [vmem:[#allocation1] ss:$9 sm:$0xff] %v2334_v5 }
 0x1d0   :  { %1116 = vst [vmem:[#allocation1 + $0x1] ss:$9 sm:$0xff] %v2335_v4 }
 0x1d1   :  { %1118 = vst [vmem:[#allocation1 + $0x2] ss:$9 sm:$0xff] %v2336_v18 }
 0x1d2   :  { %1120 = vst [vmem:[#allocation1 + $0x3] ss:$9 sm:$0xff] %v2337_v26  ;;  %1234 = vmatmul.bf16.gmra.mxu1 %v1112_v12 }
 0x1d3   :  { %1122 = vst [vmem:[#allocation1 + $0x4] ss:$9 sm:$0xff] %v2338_v51 }
 0x1d4   :  { %1124 = vst [vmem:[#allocation1 + $0x5] ss:$9 sm:$0xff] %v2339_v21 }
 0x1d5   :  { %1126 = vst [vmem:[#allocation1 + $0x6] ss:$9 sm:$0xff] %v2340_v25 }
 0x1d6   :  { %1128 = vst [vmem:[#allocation1 + $0x7] ss:$9 sm:$0xff] %v2982_v24 }
 0x1dd   :  { %v1129_v35 = vld [vmem:[#allocation1] sm:$0xff] }
 0x1de   :  { %1131 = vst [vmem:[#allocation1] ss:$9 sm:$0xff] %v870_v30 }
 0x1df   :  { %1133 = vst [vmem:[#allocation1 + $0x1] ss:$9 sm:$0xff] %v871_v34 }
 0x1e0   :  { %1135 = vst [vmem:[#allocation1 + $0x2] ss:$9 sm:$0xff] %v872_v23 }
 0x1e1   :  { %1137 = vst [vmem:[#allocation1 + $0x3] ss:$9 sm:$0xff] %v873_v38 }
 0x1e2   :  { %1139 = vst [vmem:[#allocation1 + $0x4] ss:$9 sm:$0xff] %v874_v36  ;;  %1239 = vmatmul.bf16.gmra.mxu1 %v1129_v35 }
 0x1e3   :  { %1141 = vst [vmem:[#allocation1 + $0x5] ss:$9 sm:$0xff] %v2341_v31 }
 0x1e4   :  { %1143 = vst [vmem:[#allocation1 + $0x6] ss:$9 sm:$0xff] %v2342_v43 }
 0x1e5   :  { %1145 = vst [vmem:[#allocation1 + $0x7] ss:$9 sm:$0xff] %v2343_v44 }
 0x1ec   :  { %v1146_v61 = vld [vmem:[#allocation1] sm:$0xff] }
 0x1ed   :  { %1148 = vst [vmem:[#allocation1] ss:$9 sm:$0xff] %v2344_v59 }
 0x1ee   :  { %1150 = vst [vmem:[#allocation1 + $0x1] ss:$9 sm:$0xff] %v2345_v60 }
 0x1ef   :  { %1152 = vst [vmem:[#allocation1 + $0x2] ss:$9 sm:$0xff] %v2346_v10 }
 0x1f0   :  { %1154 = vst [vmem:[#allocation1 + $0x3] ss:$9 sm:$0xff] %v2347_v63 }
 0x1f2   :  { %1244 = vmatmul.bf16.gmra.mxu1 %v1146_v61 }
 0x1f7   :  { %v1155_v5 = vld [vmem:[#allocation1] sm:$0xff] }
 0x202   :  { %1249 = vmatmul.bf16.gmra.mxu1 %v1155_v5 }
 0x21f   :  { %v1220_v7 = vpop.f32.mrf.mxu1 }
 0x220   :  { %v1267_v4 = vrot.slane %v1220_v7, 1  ;;  %v1268_v12 = vrot.slane %v1220_v7, 2  ;;  %v1269_v14 = vrot.slane %v1220_v7, 3  ;;  %1358 = vst [vmem:[#allocation1] ss:$9 sm:$0xff] %v1220_v7  ;;  %v1270_v27 = vrot.slane %v1220_v7, 4 }
 0x221   :  { %v1271_v18 = vrot.slane %v1220_v7, 5  ;;  %v1272_v26 = vrot.slane %v1220_v7, 6  ;;  %v1273_v51 = vrot.slane %v1220_v7, 7 }
 0x222   :  { %1360 = vst [vmem:[#allocation1 + $0x1] ss:$9 sm:$0xff] %v1267_v4 }
 0x223   :  { %1362 = vst [vmem:[#allocation1 + $0x2] ss:$9 sm:$0xff] %v1268_v12 }
 0x224   :  { %1364 = vst [vmem:[#allocation1 + $0x3] ss:$9 sm:$0xff] %v1269_v14 }
 0x225   :  { %1366 = vst [vmem:[#allocation1 + $0x4] ss:$9 sm:$0xff] %v1270_v27 }
 0x226   :  { %1368 = vst [vmem:[#allocation1 + $0x5] ss:$9 sm:$0xff] %v1271_v18 }
 0x227   :  { %1370 = vst [vmem:[#allocation1 + $0x6] ss:$9 sm:$0xff] %v1272_v26  ;;  %v1222_v21 = vpop.f32.mrf.mxu1 }
 0x228   :  { %1372 = vst [vmem:[#allocation1 + $0x7] ss:$9 sm:$0xff] %v1273_v51  ;;  %v1274_v22 = vrot.slane %v1222_v21, 1  ;;  %v1275_v25 = vrot.slane %v1222_v21, 2  ;;  %v1276_v2 = vrot.slane %v1222_v21, 3  ;;  %v1277_v30 = vrot.slane %v1222_v21, 4 }
 0x229   :  { %v1278_v32 = vrot.slane %v1222_v21, 5  ;;  %v1279_v35 = vrot.slane %v1222_v21, 6  ;;  %v1280_v37 = vrot.slane %v1222_v21, 7 }
 0x22f   :  { %v3003_v28 = vld [vmem:[#allocation1] sm:$0xff]  ;;  %v1225_v34 = vpop.f32.mrf.mxu1 }
 0x230   :  { %1374 = vst [vmem:[#allocation1] ss:$9 sm:$0xff] %v1222_v21  ;;  %v1281_v38 = vrot.slane %v1225_v34, 1  ;;  %v1282_v41 = vrot.slane %v1225_v34, 2  ;;  %v1283_v36 = vrot.slane %v1225_v34, 3  ;;  %v1284_v42 = vrot.slane %v1225_v34, 4 }
 0x231   :  { %1375 = vst [vmem:[#allocation1 + $0x1] ss:$9 sm:$0xff] %v1274_v22  ;;  %v1285_v43 = vrot.slane %v1225_v34, 5  ;;  %v1286_v44 = vrot.slane %v1225_v34, 6  ;;  %v1287_v47 = vrot.slane %v1225_v34, 7 }
 0x232   :  { %1376 = vst [vmem:[#allocation1 + $0x2] ss:$9 sm:$0xff] %v1275_v25 }
 0x233   :  { %1377 = vst [vmem:[#allocation1 + $0x3] ss:$9 sm:$0xff] %v1276_v2 }
 0x234   :  { %1378 = vst [vmem:[#allocation1 + $0x4] ss:$9 sm:$0xff] %v1277_v30 }
 0x237   :  { %v1227_v31 = vpop.f32.mrf.mxu1 }
 0x238   :  { %v1288_v62 = vrot.slane %v1227_v31, 1  ;;  %v1289_v49 = vrot.slane %v1227_v31, 2  ;;  %v1290_v50 = vrot.slane %v1227_v31, 3  ;;  %v1291_v55 = vrot.slane %v1227_v31, 4 }
 0x239   :  { %v1292_v59 = vrot.slane %v1227_v31, 5  ;;  %v1293_v60 = vrot.slane %v1227_v31, 6  ;;  %v1294_v61 = vrot.slane %v1227_v31, 7 }
 0x23b   :  { %v3005_v23 = vld [vmem:[#allocation1] sm:$0xff] }
 0x23c   :  { %1380 = vst [vmem:[#allocation1] ss:$9 sm:$0xff] %v1278_v32 }
 0x23d   :  { %1381 = vst [vmem:[#allocation1 + $0x1] ss:$9 sm:$0xff] %v1279_v35 }
 0x23e   :  { %1382 = vst [vmem:[#allocation1 + $0x2] ss:$9 sm:$0xff] %v1280_v37 }
 0x23f   :  { %1383 = vst [vmem:[#allocation1 + $0x3] ss:$9 sm:$0xff] %v1225_v34  ;;  %v1230_v56 = vpop.f32.mrf.mxu1 }
 0x240   :  { %1384 = vst [vmem:[#allocation1 + $0x4] ss:$9 sm:$0xff] %v1281_v38  ;;  %v1295_v10 = vrot.slane %v1230_v56, 1  ;;  %v1296_v63 = vrot.slane %v1230_v56, 2  ;;  %v1297_v5 = vrot.slane %v1230_v56, 3  ;;  %v1298_v4 = vrot.slane %v1230_v56, 4 }
 0x241   :  { %1385 = vst [vmem:[#allocation1 + $0x5] ss:$9 sm:$0xff] %v1282_v41  ;;  %v1299_v12 = vrot.slane %v1230_v56, 5  ;;  %v1300_v14 = vrot.slane %v1230_v56, 6  ;;  %v1301_v18 = vrot.slane %v1230_v56, 7 }
 0x242   :  { %1386 = vst [vmem:[#allocation1 + $0x6] ss:$9 sm:$0xff] %v1283_v36 }
 0x243   :  { %1387 = vst [vmem:[#allocation1 + $0x7] ss:$9 sm:$0xff] %v1284_v42 }
 0x247   :  { %v1232_v27 = vpop.f32.mrf.mxu1 }
 0x248   :  { %v1302_v51 = vrot.slane %v1232_v27, 1  ;;  %v1303_v21 = vrot.slane %v1232_v27, 2  ;;  %v1304_v25 = vrot.slane %v1232_v27, 3  ;;  %v1305_v2 = vrot.slane %v1232_v27, 4 }
 0x249   :  { %v1306_v30 = vrot.slane %v1232_v27, 5  ;;  %v1307_v34 = vrot.slane %v1232_v27, 6  ;;  %v1308_v35 = vrot.slane %v1232_v27, 7 }
 0x24a   :  { %v3007_v45 = vld [vmem:[#allocation1] sm:$0xff] }
 0x24b   :  { %1389 = vst [vmem:[#allocation1] ss:$9 sm:$0xff] %v1285_v43 }
 0x24c   :  { %1390 = vst [vmem:[#allocation1 + $0x1] ss:$9 sm:$0xff] %v1286_v44 }
 0x24d   :  { %1391 = vst [vmem:[#allocation1 + $0x2] ss:$9 sm:$0xff] %v1287_v47 }
 0x24e   :  { %1392 = vst [vmem:[#allocation1 + $0x3] ss:$9 sm:$0xff] %v1227_v31 }
 0x24f   :  { %1393 = vst [vmem:[#allocation1 + $0x4] ss:$9 sm:$0xff] %v1288_v62  ;;  %v1235_v22 = vpop.f32.mrf.mxu1 }
 0x250   :  { %v1309_v38 = vrot.slane %v1235_v22, 1  ;;  %v1310_v41 = vrot.slane %v1235_v22, 2  ;;  %v1311_v36 = vrot.slane %v1235_v22, 3  ;;  %v1312_v31 = vrot.slane %v1235_v22, 4 }
 0x251   :  { %v1313_v43 = vrot.slane %v1235_v22, 5  ;;  %v1314_v47 = vrot.slane %v1235_v22, 6  ;;  %v1315_v62 = vrot.slane %v1235_v22, 7 }
 0x256   :  { %v3009_v16 = vld [vmem:[#allocation1] sm:$0xff] }
 0x257   :  { %1395 = vst [vmem:[#allocation1] ss:$9 sm:$0xff] %v1289_v49  ;;  %v1237_v32 = vpop.f32.mrf.mxu1 }
 0x258   :  { %1396 = vst [vmem:[#allocation1 + $0x1] ss:$9 sm:$0xff] %v1290_v50  ;;  %v1316_v49 = vrot.slane %v1237_v32, 1  ;;  %v1317_v50 = vrot.slane %v1237_v32, 2 }
 0x259   :  { %1397 = vst [vmem:[#allocation1 + $0x2] ss:$9 sm:$0xff] %v1291_v55 }
 0x25a   :  { %1398 = vst [vmem:[#allocation1 + $0x3] ss:$9 sm:$0xff] %v1292_v59  ;;  %v1319_v59 = vrot.slane %v1237_v32, 4 }
 0x25b   :  { %1399 = vst [vmem:[#allocation1 + $0x4] ss:$9 sm:$0xff] %v1293_v60  ;;  %v1320_v60 = vrot.slane %v1237_v32, 5 }
 0x25c   :  { %1400 = vst [vmem:[#allocation1 + $0x5] ss:$9 sm:$0xff] %v1294_v61 }
 0x25d   :  { %1401 = vst [vmem:[#allocation1 + $0x6] ss:$9 sm:$0xff] %v1230_v56  ;;  %v1318_v56 = vrot.slane %v1237_v32, 3 }
 0x25e   :  { %1402 = vst [vmem:[#allocation1 + $0x7] ss:$9 sm:$0xff] %v1295_v10 }
 0x25f   :  { %v1240_v42 = vpop.f32.mrf.mxu1 }
 0x265   :  { %v3011_v7 = vld [vmem:[#allocation1] sm:$0xff] }
 0x266   :  { %1404 = vst [vmem:[#allocation1] ss:$9 sm:$0xff] %v1296_v63  ;;  %v1321_v63 = vrot.slane %v1237_v32, 6 }
 0x267   :  { %1405 = vst [vmem:[#allocation1 + $0x1] ss:$9 sm:$0xff] %v1297_v5  ;;  %v1242_v55 = vpop.f32.mrf.mxu1  ;;  %v1322_v5 = vrot.slane %v1237_v32, 7 }
 0x268   :  { %1406 = vst [vmem:[#allocation1 + $0x2] ss:$9 sm:$0xff] %v1298_v4 }
 0x269   :  { %1407 = vst [vmem:[#allocation1 + $0x3] ss:$9 sm:$0xff] %v1299_v12  ;;  %v1325_v12 = vrot.slane %v1240_v42, 3 }
 0x26a   :  { %1408 = vst [vmem:[#allocation1 + $0x4] ss:$9 sm:$0xff] %v1300_v14  ;;  %v1327_v14 = vrot.slane %v1240_v42, 5 }
 0x26f   :  { %v3021_v10 = vpop.f32.mrf.mxu1 }
 0x271   :  { %v3013_v26 = vld [vmem:[#allocation1] sm:$0xff] }
 0x272   :  { %1410 = vst [vmem:[#allocation1] ss:$9 sm:$0xff] %v1301_v18  ;;  %v1328_v18 = vrot.slane %v1240_v42, 6 }
 0x273   :  { %1411 = vst [vmem:[#allocation1 + $0x1] ss:$9 sm:$0xff] %v1232_v27 }
 0x274   :  { %1412 = vst [vmem:[#allocation1 + $0x2] ss:$9 sm:$0xff] %v1302_v51  ;;  %v1323_v51 = vrot.slane %v1240_v42, 1 }
 0x275   :  { %1413 = vst [vmem:[#allocation1 + $0x3] ss:$9 sm:$0xff] %v1303_v21  ;;  %v1324_v21 = vrot.slane %v1240_v42, 2 }
 0x276   :  { %1414 = vst [vmem:[#allocation1 + $0x4] ss:$9 sm:$0xff] %v1304_v25  ;;  %v1329_v25 = vrot.slane %v1240_v42, 7 }
 0x277   :  { %1415 = vst [vmem:[#allocation1 + $0x5] ss:$9 sm:$0xff] %v1305_v2  ;;  %v3023_v4 = vpop.f32.mrf.mxu1 }
 0x278   :  { %1416 = vst [vmem:[#allocation1 + $0x6] ss:$9 sm:$0xff] %v1306_v30  ;;  %v1330_v30 = vrot.slane %v1242_v55, 1 }
 0x279   :  { %1417 = vst [vmem:[#allocation1 + $0x7] ss:$9 sm:$0xff] %v1307_v34  ;;  %v1331_v34 = vrot.slane %v1242_v55, 2 }
 0x27f   :  { %v3027_v2 = vpop.f32.mrf.mxu1 }
 0x280   :  { %v3015_v37 = vld [vmem:[#allocation1] sm:$0xff] }
 0x281   :  { %1419 = vst [vmem:[#allocation1] ss:$9 sm:$0xff] %v1308_v35  ;;  %v1332_v35 = vrot.slane %v1242_v55, 3 }
 0x282   :  { %1420 = vst [vmem:[#allocation1 + $0x1] ss:$9 sm:$0xff] %v1235_v22  ;;  %v1326_v22 = vrot.slane %v1240_v42, 4 }
 0x283   :  { %1421 = vst [vmem:[#allocation1 + $0x2] ss:$9 sm:$0xff] %v1309_v38 }
 0x284   :  { %1422 = vst [vmem:[#allocation1 + $0x3] ss:$9 sm:$0xff] %v1310_v41  ;;  %v1333_v41 = vrot.slane %v1242_v55, 4 }
 0x285   :  { %1423 = vst [vmem:[#allocation1 + $0x4] ss:$9 sm:$0xff] %v1311_v36  ;;  %v1334_v36 = vrot.slane %v1242_v55, 5 }
 0x287   :  { %v1252_v38 = vpop.f32.mrf.mxu1 }
 0x288   :  { %v2480_v38 = vld [vmem:[#allocation5 + $0x70] sm:$0xff] }
 0x28c   :  { %v3017_v44 = vld [vmem:[#allocation1] sm:$0xff] }
 0x28d   :  { %1425 = vst [vmem:[#allocation1] ss:$9 sm:$0xff] %v1312_v31  ;;  %v1336_v31 = vrot.slane %v1242_v55, 7 }
 0x28e   :  { %1426 = vst [vmem:[#allocation1 + $0x1] ss:$9 sm:$0xff] %v1313_v43 }
 0x28f   :  { %1427 = vst [vmem:[#allocation1 + $0x2] ss:$9 sm:$0xff] %v1314_v47  ;;  %v2487_v47 = vld [vmem:[#allocation5 + $0xa8] sm:$0xff] }
 0x290   :  { %1428 = vst [vmem:[#allocation1 + $0x3] ss:$9 sm:$0xff] %v1315_v62  ;;  %v1337_v62 = vrot.slane %v3021_v10, 1  ;;  %1814 = vmatpush.bf16.msra.mxu2 %v2487_v47  ;;  %v1351_v47 = vrot.slane %v3027_v2, 1 }
 0x291   :  { %1429 = vst [vmem:[#allocation1 + $0x4] ss:$9 sm:$0xff] %v1237_v32 }
 0x292   :  { %1430 = vst [vmem:[#allocation1 + $0x5] ss:$9 sm:$0xff] %v1316_v49  ;;  %v1338_v49 = vrot.slane %v3021_v10, 2 }
 0x293   :  { %1431 = vst [vmem:[#allocation1 + $0x6] ss:$9 sm:$0xff] %v1317_v50  ;;  %v1339_v50 = vrot.slane %v3021_v10, 3 }
 0x294   :  { %1432 = vst [vmem:[#allocation1 + $0x7] ss:$9 sm:$0xff] %v1318_v56  ;;  %v1340_v56 = vrot.slane %v3021_v10, 4 }
 0x29b   :  { %v3019_v61 = vld [vmem:[#allocation1] sm:$0xff] }
 0x29c   :  { %1434 = vst [vmem:[#allocation1] ss:$9 sm:$0xff] %v1319_v59  ;;  %v2486_v59 = vld [vmem:[#allocation5 + $0xa0] sm:$0xff] }
 0x29d   :  { %1435 = vst [vmem:[#allocation1 + $0x1] ss:$9 sm:$0xff] %v1320_v60  ;;  %1815 = vmatpush.bf16.msra.mxu2 %v2486_v59  ;;  %v2485_v60 = vld [vmem:[#allocation5 + $0x98] sm:$0xff] }
 0x29e   :  { %1436 = vst [vmem:[#allocation1 + $0x2] ss:$9 sm:$0xff] %v1321_v63  ;;  %v2484_v63 = vld [vmem:[#allocation5 + $0x90] sm:$0xff] }
 0x29f   :  { %1437 = vst [vmem:[#allocation1 + $0x3] ss:$9 sm:$0xff] %v1322_v5  ;;  %v1342_v5 = vrot.slane %v3021_v10, 6 }
 0x2a0   :  { %1438 = vst [vmem:[#allocation1 + $0x4] ss:$9 sm:$0xff] %v1240_v42  ;;  %v1335_v42 = vrot.slane %v1242_v55, 6 }
 0x2a1   :  { %1816 = vmatpush.bf16.msra.mxu2 %v2485_v60 }
 0x2a5   :  { %1817 = vmatpush.bf16.msra.mxu2 %v2484_v63  ;;  %v1354_v63 = vrot.slane %v3027_v2, 4 }
 0x2a7   :  { %v3025_v27 = vld [vmem:[#allocation1] sm:$0xff] }
 0x2a8   :  { %1442 = vst [vmem:[#allocation1 + $0x2] ss:$9 sm:$0xff] %v1325_v12  ;;  %v1343_v12 = vrot.slane %v3021_v10, 7 }
 0x2a9   :  { %1444 = vst [vmem:[#allocation1 + $0x4] ss:$9 sm:$0xff] %v1327_v14 }
 0x2aa   :  { %1445 = vst [vmem:[#allocation1 + $0x5] ss:$9 sm:$0xff] %v1328_v18  ;;  %v1344_v18 = vrot.slane %v3023_v4, 1 }
 0x2ab   :  { %1440 = vst [vmem:[#allocation1] ss:$9 sm:$0xff] %v1323_v51  ;;  %v2483_v51 = vld [vmem:[#allocation5 + $0x88] sm:$0xff] }
 0x2ac   :  { %1441 = vst [vmem:[#allocation1 + $0x1] ss:$9 sm:$0xff] %v1324_v21  ;;  %v1345_v21 = vrot.slane %v3023_v4, 2  ;;  %1818 = vmatpush.bf16.msra.mxu2 %v2483_v51 }
 0x2ad   :  { %1443 = vst [vmem:[#allocation1 + $0x3] ss:$9 sm:$0xff] %v1326_v22  ;;  %v2482_v22 = vld [vmem:[#allocation5 + $0x80] sm:$0xff] }
 0x2ae   :  { %1446 = vst [vmem:[#allocation1 + $0x6] ss:$9 sm:$0xff] %v1329_v25  ;;  %v2481_v25 = vld [vmem:[#allocation5 + $0x78] sm:$0xff] }
 0x2af   :  { %1447 = vst [vmem:[#allocation1 + $0x7] ss:$9 sm:$0xff] %v1242_v55  ;;  %v1341_v55 = vrot.slane %v3021_v10, 5 }
 0x2b0   :  { %1819 = vmatpush.bf16.msra.mxu2 %v2482_v22 }
 0x2b4   :  { %1820 = vmatpush.bf16.msra.mxu2 %v2481_v25  ;;  %v1356_v25 = vrot.slane %v3027_v2, 6 }
 0x2b6   :  { %v3029_v32 = vld [vmem:[#allocation1] sm:$0xff] }
 0x2b7   :  { %1449 = vst [vmem:[#allocation1] ss:$9 sm:$0xff] %v1330_v30  ;;  %v2489_v30 = vld [vmem:[#allocation5 + $0xb8] sm:$0xff] }
 0x2b8   :  { %1450 = vst [vmem:[#allocation1 + $0x1] ss:$9 sm:$0xff] %v1331_v34  ;;  %v1347_v34 = vrot.slane %v3023_v4, 4  ;;  %1859 = vmatpush.bf16.msra.mxu3 %v2489_v30  ;;  %1821 = vmatpush.bf16.msra.mxu2 %v2480_v38  ;;  %v1357_v30 = vrot.slane %v3027_v2, 7 }
 0x2b9   :  { %1451 = vst [vmem:[#allocation1 + $0x2] ss:$9 sm:$0xff] %v1332_v35 }
 0x2ba   :  { %1452 = vst [vmem:[#allocation1 + $0x3] ss:$9 sm:$0xff] %v1333_v41  ;;  %v2488_v41 = vld [vmem:[#allocation5 + $0xb0] sm:$0xff] }
 0x2bb   :  { %1453 = vst [vmem:[#allocation1 + $0x4] ss:$9 sm:$0xff] %v1334_v36  ;;  %v1348_v36 = vrot.slane %v3023_v4, 5 }
 0x2bc   :  { %1860 = vmatpush.bf16.msra.mxu3 %v2488_v41 }
 0x2c2   :  { %v3031_v43 = vld [vmem:[#allocation1] sm:$0xff] }
 0x2c3   :  { %1455 = vst [vmem:[#allocation1] ss:$9 sm:$0xff] %v1335_v42  ;;  %v1349_v42 = vrot.slane %v3023_v4, 6 }
 0x2c4   :  { %1456 = vst [vmem:[#allocation1 + $0x1] ss:$9 sm:$0xff] %v1336_v31  ;;  %v1350_v31 = vrot.slane %v3023_v4, 7 }
 0x2c5   :  { %1457 = vst [vmem:[#allocation1 + $0x2] ss:$9 sm:$0xff] %v3021_v10  ;;  %v1346_v10 = vrot.slane %v3023_v4, 3 }
 0x2c6   :  { %1458 = vst [vmem:[#allocation1 + $0x3] ss:$9 sm:$0xff] %v1337_v62  ;;  %v1352_v62 = vrot.slane %v3027_v2, 2 }
 0x2c7   :  { %1459 = vst [vmem:[#allocation1 + $0x4] ss:$9 sm:$0xff] %v1338_v49  ;;  %v2509_v49 = vld [vmem:[#allocation2 + $0x8] sm:$0xff] }
 0x2c8   :  { %1460 = vst [vmem:[#allocation1 + $0x5] ss:$9 sm:$0xff] %v1339_v50  ;;  %v1575_v50 = vrot.slane %v2509_v49, 2 }
 0x2c9   :  { %1461 = vst [vmem:[#allocation1 + $0x6] ss:$9 sm:$0xff] %v1340_v56  ;;  %v2510_v56 = vld [vmem:[#allocation2 + $0x10] sm:$0xff] }
 0x2ca   :  { %1462 = vst [vmem:[#allocation1 + $0x7] ss:$9 sm:$0xff] %v1341_v55  ;;  %v1576_v59 = vrot.slane %v2510_v56, 2  ;;  %v1603_v55 = vrot.slane %v1575_v50, 6  ;;  %v2513_v50 = vld [vmem:[#allocation2 + $0x28] sm:$0xff] }
 0x2cb   :  { %v1579_v56 = vrot.slane %v2513_v50, 2 }
 0x2cc   :  { %v1604_v60 = vrot.slane %v1576_v59, 6  ;;  %v1623_v51 = vsel %vm1613_vm3, %v2916_v11, %v1603_v55  ;;  %v1626_v22 = vsel %vm1617_vm4, %v2916_v11, %v1603_v55 }
 0x2cd   :  { %v1628_v41 = vrot.slane %v1626_v22, 4  ;;  %v1607_v22 = vrot.slane %v1579_v56, 6 }
 0x2d1   :  { %v3041_v14 = vld [vmem:[#allocation1] sm:$0xff] }
 0x2d2   :  { %1464 = vst [vmem:[#allocation1] ss:$9 sm:$0xff] %v1342_v5 }
 0x2d3   :  { %1465 = vst [vmem:[#allocation1 + $0x1] ss:$9 sm:$0xff] %v1343_v12  ;;  %v2511_v12 = vld [vmem:[#allocation2] sm:$0xff] }
 0x2d4   :  { %1466 = vst [vmem:[#allocation1 + $0x2] ss:$9 sm:$0xff] %v3023_v4  ;;  %v1353_v4 = vrot.slane %v3027_v2, 3 }
 0x2d5   :  { %1467 = vst [vmem:[#allocation1 + $0x3] ss:$9 sm:$0xff] %v1344_v18  ;;  %v1574_v18 = vrot.slane %v2511_v12, 2  ;;  %v2514_v12 = vld [vmem:[#allocation2 + $0x18] sm:$0xff] }
 0x2d6   :  { %1468 = vst [vmem:[#allocation1 + $0x4] ss:$9 sm:$0xff] %v1345_v21  ;;  %v1355_v21 = vrot.slane %v3027_v2, 5 }
 0x2d7   :  { %v1602_v38 = vrot.slane %v1574_v18, 6  ;;  %v1577_v18 = vrot.slane %v2514_v12, 2 }
 0x2d9   :  { %v1612_v59 = vsel %vm1610_vm5, %v2909_v6, %v1602_v38 }
 0x2dd   :  { %v3048_v35 = vld [vmem:[#allocation1] sm:$0xff] }
 0x2de   :  { %1470 = vst [vmem:[#allocation1] ss:$9 sm:$0xff] %v1346_v10  ;;  %v1625_v10 = vrot.slane %v1623_v51, 2 }
 0x2df   :  { %1471 = vst [vmem:[#allocation1 + $0x1] ss:$9 sm:$0xff] %v1347_v34  ;;  %v1631_v34 = vsel %vm1613_vm3, %v2936_v53, %v1604_v60 }
 0x2e0   :  { %1472 = vst [vmem:[#allocation1 + $0x2] ss:$9 sm:$0xff] %v1348_v36  ;;  %v2512_v36 = vld [vmem:[#allocation2 + $0x20] sm:$0xff] }
 0x2e1   :  { %1473 = vst [vmem:[#allocation1 + $0x3] ss:$9 sm:$0xff] %v1349_v42  ;;  %v1578_v42 = vrot.slane %v2512_v36, 2 }
 0x2e2   :  { %1474 = vst [vmem:[#allocation1 + $0x4] ss:$9 sm:$0xff] %v1350_v31  ;;  %v1630_v31 = vsel %vm1610_vm5, %v2936_v53, %v1604_v60 }
 0x2e3   :  { %1475 = vst [vmem:[#allocation1 + $0x5] ss:$9 sm:$0xff] %v3027_v2  ;;  %v1614_v2 = vsel %vm1613_vm3, %v2909_v6, %v1602_v38  ;;  %v1606_v49 = vrot.slane %v1578_v42, 6 }
 0x2e4   :  { %1476 = vst [vmem:[#allocation1 + $0x6] ss:$9 sm:$0xff] %v1351_v47  ;;  %v1633_v47 = vrot.slane %v1631_v34, 2 }
 0x2e5   :  { %1477 = vst [vmem:[#allocation1 + $0x7] ss:$9 sm:$0xff] %v1352_v62  ;;  %v1618_v62 = vsel %vm1617_vm4, %v2909_v6, %v1602_v38  ;;  %v2515_v6 = vld [vmem:[#allocation2 + $0x30] sm:$0xff]  ;;  %v1605_v38 = vrot.slane %v1577_v18, 6 }
 0x2e6   :  { %v1620_v51 = vrot.slane %v1618_v62, 4  ;;  %v1654_v62 = vsel %vm1610_vm5, %v2969_v48, %v1607_v22 }
 0x2e7   :  { %v1639_v50 = vsel %vm1613_vm3, %v2943_v40, %v1605_v38 }
 0x2ec   :  { %v3058_v5 = vld [vmem:[#allocation1] sm:$0xff] }
 0x2ed   :  { %1479 = vst [vmem:[#allocation1] ss:$9 sm:$0xff] %v1353_v4  ;;  %v1616_v4 = vrot.slane %v1614_v2, 2 }
 0x2ee   :  { %1480 = vst [vmem:[#allocation1 + $0x1] ss:$9 sm:$0xff] %v1354_v63 }
 0x2ef   :  { %1481 = vst [vmem:[#allocation1 + $0x2] ss:$9 sm:$0xff] %v1355_v21  ;;  %v1647_v21 = vsel %vm1613_vm3, %v2959_v39, %v1606_v49 }
 0x2f0   :  { %1482 = vst [vmem:[#allocation1 + $0x3] ss:$9 sm:$0xff] %v1356_v25  ;;  %v1622_v25 = vsel %vm1610_vm5, %v2916_v11, %v1603_v55  ;;  %v1649_v36 = vrot.slane %v1647_v21, 2  ;;  %v1634_v11 = vsel %vm1617_vm4, %v2936_v53, %v1604_v60  ;;  %v1638_v53 = vsel %vm1610_vm5, %v2943_v40, %v1605_v38 }
 0x2f1   :  { %1483 = vst [vmem:[#allocation1 + $0x4] ss:$9 sm:$0xff] %v1357_v30  ;;  %v1650_v30 = vsel %vm1617_vm4, %v2959_v39, %v1606_v49  ;;  %v1636_v56 = vrot.slane %v1634_v11, 4  ;;  %v1641_v60 = vrot.slane %v1639_v50, 2 }
 0x2f2   :  { %1688 = vst [vmem:[#allocation1 + $0x20] ss:$4 sm:$0xff] %v1625_v10  ;;  %v1580_v10 = vrot.slane %v2515_v6, 2  ;;  %v1652_v2 = vrot.slane %v1650_v30, 4 }
 0x2f3   :  { %1691 = vst [vmem:[#allocation1 + $0x21] ss:$4 sm:$0xff] %v1628_v41  ;;  %v1646_v41 = vsel %vm1610_vm5, %v2959_v39, %v1606_v49  ;;  %v1642_v49 = vsel %vm1617_vm4, %v2943_v40, %v1605_v38  ;;  %v1655_v38 = vsel %vm1613_vm3, %v2969_v48, %v1607_v22 }
 0x2f4   :  { %1693 = vst [vmem:[#allocation1 + $0x22] ss:$4 sm:$0xff] %v1630_v31  ;;  %v2516_v31 = vld [vmem:[#allocation2 + $0x38] sm:$0xff]  ;;  %v1608_v55 = vrot.slane %v1580_v10, 6  ;;  %v1644_v18 = vrot.slane %v1642_v49, 4 }
 0x2f5   :  { %1696 = vst [vmem:[#allocation1 + $0x23] ss:$4 sm:$0xff] %v1633_v47  ;;  %v1581_v47 = vrot.slane %v2516_v31, 2  ;;  %v1657_v31 = vrot.slane %v1655_v38, 2 }
 0x2f6   :  { %v1666_v12 = vsel %vm1617_vm4, %v2982_v24, %v1608_v55 }
 0x2f7   :  { %v1609_v39 = vrot.slane %v1581_v47, 6  ;;  %v1668_v21 = vrot.slane %v1666_v12, 4  ;;  %v2496_v12 = vld [vmem:[#allocation7 + $0x30] sm:$0xff] }
 0x2f8   :  { %v3077_v63 = vld [vmem:[#allocation1] sm:$0xff] }
 0x2f9   :  { %1677 = vst [vmem:[#allocation1] ss:$4 sm:$0xff] %v1612_v59  ;;  %v1670_v6 = vsel %vm1610_vm5, %v2987_v1, %v1609_v39 }
 0x2fa   :  { %1680 = vst [vmem:[#allocation1 + $0x1] ss:$4 sm:$0xff] %v1616_v4 }
 0x2fb   :  { %1683 = vst [vmem:[#allocation1 + $0x2] ss:$4 sm:$0xff] %v1620_v51  ;;  %v1671_v51 = vsel %vm1613_vm3, %v2987_v1, %v1609_v39 }
 0x2fc   :  { %1685 = vst [vmem:[#allocation1 + $0x3] ss:$4 sm:$0xff] %v1622_v25  ;;  %v1699_v34 = vld.sshfl [vmem:[#allocation1 + $0x20] sm:$0xff pattern:$0x73625140]  ;;  %v1674_v25 = vsel %vm1617_vm4, %v2987_v1, %v1609_v39  ;;  %v1673_v10 = vrot.slane %v1671_v51, 2  ;;  %v1662_v1 = vsel %vm1610_vm5, %v2982_v24, %v1608_v55 }
 0x2fd   :  { %v1700_v42 = vld.sshfl [vmem:[#allocation1 + $0x28] sm:$0xff pattern:$0x73625140] }
 0x2fe   :  { %1708 = vst [vmem:[#allocation1 + $0x20] ss:$4 sm:$0xff] %v1646_v41  ;;  %v1658_v41 = vsel %vm1617_vm4, %v2969_v48, %v1607_v22 }
 0x2ff   :  { %1710 = vst [vmem:[#allocation1 + $0x21] ss:$4 sm:$0xff] %v1649_v36  ;;  %v1676_v36 = vrot.slane %v1674_v25, 4  ;;  %v1660_v47 = vrot.slane %v1658_v41, 4  ;;  %v2495_v41 = vld [vmem:[#allocation7 + $0x28] sm:$0xff] }
 0x300   :  { %1712 = vst [vmem:[#allocation1 + $0x22] ss:$4 sm:$0xff] %v1652_v2  ;;  %v1663_v2 = vsel %vm1613_vm3, %v2982_v24, %v1608_v55 }
 0x301   :  { %1713 = vst [vmem:[#allocation1 + $0x23] ss:$4 sm:$0xff] %v1654_v62  ;;  %v1665_v50 = vrot.slane %v1663_v2, 2 }
 0x303   :  { %v1697_v59 = vld.sshfl [vmem:[#allocation1] sm:$0xff pattern:$0x73625140]  ;;  %v1698_v4 = vld.sshfl [vmem:[#allocation1 + $0x8] sm:$0xff pattern:$0x73625140] }
 0x304   :  { %1822 = vmatmul.bf16.vlgmr.msra.gmra.mxu2 %v1697_v59  ;;  %2420 = vmatmul.msk.bf16.vlgmr.msra.gmra.mxu3 %vm224_vm0, %v1698_v4  ;;  %1702 = vst [vmem:[#allocation1] ss:$4 sm:$0xff] %v1636_v56  ;;  %v2497_v56 = vld [vmem:[#allocation7 + $0x38] sm:$0xff] }
 0x305   :  { %1703 = vst [vmem:[#allocation1 + $0x1] ss:$4 sm:$0xff] %v1638_v53  ;;  %2209 = vmatpush.bf16.msrb.mxu3 %v2497_v56 }
 0x306   :  { %1705 = vst [vmem:[#allocation1 + $0x2] ss:$4 sm:$0xff] %v1641_v60 }
 0x307   :  { %1707 = vst [vmem:[#allocation1 + $0x3] ss:$4 sm:$0xff] %v1644_v18 }
 0x308   :  { %v1716_v40 = vld.sshfl [vmem:[#allocation1 + $0x20] sm:$0xff pattern:$0x73625140]  ;;  %v1717_v30 = vld.sshfl [vmem:[#allocation1 + $0x28] sm:$0xff pattern:$0x73625140] }
 0x309   :  { %1726 = vst [vmem:[#allocation1 + $0x20] ss:$4 sm:$0xff] %v1668_v21  ;;  %2210 = vmatpush.bf16.msrb.mxu3 %v2496_v12 }
 0x30a   :  { %1727 = vst [vmem:[#allocation1 + $0x21] ss:$4 sm:$0xff] %v1670_v6 }
 0x30b   :  { %1729 = vst [vmem:[#allocation1 + $0x22] ss:$4 sm:$0xff] %v1673_v10 }
 0x30c   :  { %1731 = vst [vmem:[#allocation1 + $0x23] ss:$4 sm:$0xff] %v1676_v36 }
 0x30d   :  { %2211 = vmatpush.bf16.msrb.mxu3 %v2495_v41 }
 0x30e   :  { %v1714_v11 = vld.sshfl [vmem:[#allocation1] sm:$0xff pattern:$0x73625140]  ;;  %v1715_v62 = vld.sshfl [vmem:[#allocation1 + $0x8] sm:$0xff pattern:$0x73625140] }
 0x30f   :  { %1719 = vst [vmem:[#allocation1] ss:$4 sm:$0xff] %v1657_v31 }
 0x310   :  { %1721 = vst [vmem:[#allocation1 + $0x1] ss:$4 sm:$0xff] %v1660_v47 }
 0x311   :  { %1722 = vst [vmem:[#allocation1 + $0x2] ss:$4 sm:$0xff] %v1662_v1 }
 0x312   :  { %1724 = vst [vmem:[#allocation1 + $0x3] ss:$4 sm:$0xff] %v1665_v50  ;;  %v2494_v50 = vld [vmem:[#allocation7 + $0x20] sm:$0xff] }
 0x313   :  { %v1734_v39 = vld.sshfl [vmem:[#allocation1 + $0x20] sm:$0xff pattern:$0x73625140]  ;;  %v1735_v24 = vld.sshfl [vmem:[#allocation1 + $0x28] sm:$0xff pattern:$0x73625140]  ;;  %2212 = vmatpush.bf16.msrb.mxu3 %v2494_v50 }
 0x314   :  { %1827 = vmatmul.bf16.gmra.mxu2 %v1699_v34  ;;  %2421 = vmatmul.msk.bf16.gmra.mxu3 %vm224_vm0, %v1700_v42 }
 0x319   :  { %v1732_v48 = vld.sshfl [vmem:[#allocation1] sm:$0xff pattern:$0x73625140]  ;;  %v1733_v22 = vld.sshfl [vmem:[#allocation1 + $0x8] sm:$0xff pattern:$0x73625140] }
 0x324   :  { %1832 = vmatmul.bf16.gmra.mxu2 %v1714_v11  ;;  %2422 = vmatmul.msk.bf16.gmra.mxu3 %vm224_vm0, %v1715_v62  ;;  %v690_v11 = vsel %vm689_vm6, %v2881_v58, -inf }
 0x334   :  { %1837 = vmatmul.bf16.gmra.mxu2 %v1716_v40  ;;  %2423 = vmatmul.msk.bf16.gmra.mxu3 %vm224_vm0, %v1717_v30 }
 0x344   :  { %1842 = vmatmul.bf16.gmra.mxu2 %v1732_v48  ;;  %2424 = vmatmul.msk.bf16.gmra.mxu3 %vm224_vm0, %v1733_v22  ;;  %v691_v48 = vmax.f32 %v2879_v54, %v690_v11  ;;  %v698_v22 = vsel %vm689_vm6, %v2885_v8, -inf }
 0x354   :  { %1847 = vmatmul.bf16.gmra.mxu2 %v1734_v39  ;;  %2425 = vmatmul.msk.bf16.gmra.mxu3 %vm224_vm0, %v1735_v24  ;;  %v706_v39 = vsel %vm689_vm6, %v2889_v19, -inf  ;;  %v714_v24 = vsel %vm689_vm6, %v2893_v29, -inf  ;;  %v722_v19 = vsel %vm689_vm6, %v2897_v0, -inf  ;;  %v2493_v0 = vld [vmem:[#allocation7 + $0x18] sm:$0xff] }
 0x355   :  { %v707_v56 = vmax.f32 %v2887_v13, %v706_v39  ;;  %v715_v54 = vmax.f32 %v2891_v20, %v714_v24  ;;  %v730_v13 = vsel %vm689_vm6, %v2901_v52, -inf  ;;  %2213 = vmatpush.bf16.msrb.mxu3 %v2493_v0  ;;  %v738_v39 = vsel %vm689_vm6, %v2905_v15, -inf }
 0x387   :  { %v1823_v55 = vpop.f32.mrf.mxu2  ;;  %v1862_v34 = vpop.f32.mrf.mxu3 }
 0x388   :  { %v1863_v49 = vadd.f32 %v1862_v34, %v1823_v55  ;;  %v699_v34 = vmax.f32 %v2883_v3, %v698_v22 }
 0x38a   :  { %v1904_v42 = vrot.slane %v1863_v49, 4  ;;  %1916 = vst [vmem:[#allocation1] ss:$2 sm:$0xff] %v1863_v49 }
 0x38c   :  { %1918 = vst [vmem:[#allocation1 + $0x1] ss:$2 sm:$0xff] %v1904_v42  ;;  %v692_v42 = vrot.slane %v691_v48, 4 }
 0x38e   :  { %v693_v29 = vmax.f32 %v691_v48, %v692_v42 }
 0x38f   :  { %v1825_v59 = vpop.f32.mrf.mxu2  ;;  %v1864_v4 = vpop.f32.mrf.mxu3 }
 0x390   :  { %v1865_v53 = vadd.f32 %v1864_v4, %v1825_v59  ;;  %v700_v4 = vrot.slane %v699_v34, 4 }
 0x392   :  { %v1905_v60 = vrot.slane %v1865_v53, 4  ;;  %1920 = vst [vmem:[#allocation1 + $0x10] ss:$2 sm:$0xff] %v1865_v53  ;;  %v708_v53 = vrot.slane %v707_v56, 4  ;;  %v701_v20 = vmax.f32 %v699_v34, %v700_v4 }
 0x393   :  { %v3119_v10 = vld.sshfl [vmem:[#allocation1] sm:$0xff pattern:$0x75316420] }
 0x394   :  { %1924 = vst [vmem:[#allocation1 + $0x20] ss:$2 sm:$0xff] %v1905_v60  ;;  %v716_v60 = vrot.slane %v715_v54, 4 }
 0x397   :  { %v1828_v18 = vpop.f32.mrf.mxu2  ;;  %v1867_v51 = vpop.f32.mrf.mxu3 }
 0x398   :  { %v1868_v21 = vadd.f32 %v1867_v51, %v1828_v18  ;;  %v723_v18 = vmax.f32 %v2895_v33, %v722_v19 }
 0x399   :  { %v3121_v2 = vld.sshfl [vmem:[#allocation1 + $0x10] sm:$0xff pattern:$0x75316420] }
 0x39a   :  { %v1906_v25 = vrot.slane %v1868_v21, 4  ;;  %1926 = vst [vmem:[#allocation1 + $0x21] ss:$2 sm:$0xff] %v1868_v21  ;;  %v694_v21 = vrot.slane %v693_v29, 2  ;;  %v724_v41 = vrot.slane %v723_v18, 4 }
 0x39c   :  { %1928 = vst [vmem:[#allocation1 + $0x30] ss:$2 sm:$0xff] %v1906_v25  ;;  %v695_v33 = vmax.f32 %v693_v29, %v694_v21  ;;  %v725_v50 = vmax.f32 %v723_v18, %v724_v41  ;;  %v2492_v29 = vld [vmem:[#allocation7 + $0x10] sm:$0xff]  ;;  %v1518_v18 = vsel %vm1501_vm7, %v3013_v26, -inf  ;;  %v1534_v21 = vsel %vm1501_vm7, %v3025_v27, -inf  ;;  %v2490_v27 = vld [vmem:[#allocation7] sm:$0xff] }
 0x39d   :  { %2214 = vmatpush.bf16.msrb.mxu3 %v2492_v29  ;;  %v1519_v41 = vmax.f32 %v3011_v7, %v1518_v18  ;;  %v746_v29 = vsel %vm689_vm6, %v2920_v17, -inf }
 0x39e   :  { %v696_v24 = vrot.slane %v695_v33, 1 }
 0x39f   :  { %v1830_v40 = vpop.f32.mrf.mxu2  ;;  %v1869_v30 = vpop.f32.mrf.mxu3 }
 0x3a0   :  { %v1870_v6 = vadd.f32 %v1869_v30, %v1830_v40  ;;  %v709_v40 = vmax.f32 %v707_v56, %v708_v53  ;;  %v717_v30 = vmax.f32 %v715_v54, %v716_v60  ;;  %v726_v54 = vrot.slane %v725_v50, 2 }
 0x3a1   :  { %v3125_v1 = vld.sshfl [vmem:[#allocation1 + $0x20] sm:$0xff pattern:$0x75316420]  ;;  %v3153_v15 = vmax.f32 %v695_v33, %v696_v24 }
 0x3a2   :  { %v1907_v38 = vrot.slane %v1870_v6, 4  ;;  %1931 = vst [vmem:[#allocation1] ss:$2 sm:$0xff] %v1870_v6 }
 0x3a3   :  { %v3137_v8 = vld.sshfl [vmem:[#allocation1 + $0x30] sm:$0xff pattern:$0x75316420] }
 0x3a4   :  { %1932 = vst [vmem:[#allocation1 + $0x1] ss:$2 sm:$0xff] %v1907_v38  ;;  %v731_v38 = vmax.f32 %v2899_v46, %v730_v13  ;;  %v1502_v46 = vsel %vm1501_vm7, %v3005_v23, -inf  ;;  %v1510_v23 = vsel %vm1501_vm7, %v3009_v16, -inf }
 0x3a5   :  { %v1503_v4 = vmax.f32 %v3003_v28, %v1502_v46  ;;  %v1511_v26 = vmax.f32 %v3007_v45, %v1510_v23  ;;  %v1978_v45 = vsel %vm1977_vm8, %v3121_v2, -inf }
 0x3a6   :  { %v732_v52 = vrot.slane %v731_v38, 4  ;;  %v1979_v24 = vmax.f32 %v3119_v10, %v1978_v45  ;;  %v1550_v10 = vsel %vm1501_vm7, %v3048_v35, -inf }
 0x3a7   :  { %v1833_v36 = vpop.f32.mrf.mxu2  ;;  %v1872_v31 = vpop.f32.mrf.mxu3 }
 0x3a8   :  { %v1873_v47 = vadd.f32 %v1872_v31, %v1833_v36  ;;  %v702_v36 = vrot.slane %v701_v20, 2  ;;  %v710_v31 = vrot.slane %v709_v40, 2  ;;  %v733_v42 = vmax.f32 %v731_v38, %v732_v52 }
 0x3aa   :  { %v1908_v62 = vrot.slane %v1873_v47, 4  ;;  %1933 = vst [vmem:[#allocation1 + $0x10] ss:$2 sm:$0xff] %v1873_v47  ;;  %v718_v47 = vrot.slane %v717_v30, 2  ;;  %v703_v48 = vmax.f32 %v701_v20, %v702_v36  ;;  %v3161_v20 = vmax.f32 %v725_v50, %v726_v54 }
 0x3ab   :  { %v3144_v25 = vld.sshfl [vmem:[#allocation1] sm:$0xff pattern:$0x75316420] }
 0x3ac   :  { %1936 = vst [vmem:[#allocation1 + $0x20] ss:$2 sm:$0xff] %v1908_v62  ;;  %v719_v34 = vmax.f32 %v717_v30, %v718_v47  ;;  %v704_v19 = vrot.slane %v703_v48, 1  ;;  %v1986_v30 = vsel %vm1977_vm8, %v3137_v8, -inf  ;;  %v1535_v8 = vmax.f32 %v3019_v61, %v1534_v21 }
 0x3ad   :  { %v1987_v7 = vmax.f32 %v3125_v1, %v1986_v30 }
 0x3ae   :  { %v720_v60 = vrot.slane %v719_v34, 1  ;;  %v3165_v16 = vmax.f32 %v703_v48, %v704_v19  ;;  %v1542_v48 = vsel %vm1501_vm7, %v3031_v43, -inf }
 0x3af   :  { %v1835_v55 = vpop.f32.mrf.mxu2  ;;  %v1874_v58 = vpop.f32.mrf.mxu3 }
 0x3b0   :  { %v1875_v49 = vadd.f32 %v1874_v58, %v1835_v55  ;;  %v711_v58 = vmax.f32 %v709_v40, %v710_v31  ;;  %v1504_v40 = vrot.slane %v1503_v4, 4  ;;  %v3174_v31 = vmax.f32 %v719_v34, %v720_v60 }
 0x3b1   :  { %v1935_v55 = vld.sshfl [vmem:[#allocation1 + $0x10] sm:$0xff pattern:$0x75316420] }
 0x3b2   :  { %v1909_v59 = vrot.slane %v1875_v49, 4  ;;  %1937 = vst [vmem:[#allocation1 + $0x21] ss:$2 sm:$0xff] %v1875_v49  ;;  %v712_v53 = vrot.slane %v711_v58, 1  ;;  %v1994_v52 = vsel %vm1977_vm8, %v1935_v55, -inf  ;;  %v1505_v61 = vmax.f32 %v1503_v4, %v1504_v40 }
 0x3b3   :  { %v1995_v46 = vmax.f32 %v3144_v25, %v1994_v52  ;;  %v1988_v4 = vrot.slane %v1987_v7, 4 }
 0x3b4   :  { %1938 = vst [vmem:[#allocation1 + $0x30] ss:$2 sm:$0xff] %v1909_v59  ;;  %v739_v59 = vmax.f32 %v2903_v57, %v738_v39  ;;  %v1526_v57 = vsel %vm1501_vm7, %v3017_v44, -inf  ;;  %v3170_v38 = vmax.f32 %v711_v58, %v712_v53  ;;  %v1520_v39 = vrot.slane %v1519_v41, 4 }
 0x3b5   :  { %v1527_v36 = vmax.f32 %v3015_v37, %v1526_v57  ;;  %v1536_v58 = vrot.slane %v1535_v8, 4  ;;  %v1506_v25 = vrot.slane %v1505_v61, 2  ;;  %v1989_v21 = vmax.f32 %v1987_v7, %v1988_v4 }
 0x3b6   :  { %v1521_v60 = vmax.f32 %v1519_v41, %v1520_v39 }
 0x3b7   :  { %v1838_v12 = vpop.f32.mrf.mxu2  ;;  %v1877_v3 = vpop.f32.mrf.mxu3  ;;  %v1528_v2 = vrot.slane %v1527_v36, 4  ;;  %v1537_v18 = vmax.f32 %v1535_v8, %v1536_v58  ;;  %v1990_v7 = vrot.slane %v1989_v21, 2 }
 0x3b8   :  { %v1878_v51 = vadd.f32 %v1877_v3, %v1838_v12  ;;  %v2491_v12 = vld [vmem:[#allocation7 + $0x8] sm:$0xff]  ;;  %v734_v3 = vrot.slane %v733_v42, 2 }
 0x3b9   :  { %v1939_v56 = vld.sshfl [vmem:[#allocation1 + $0x20] sm:$0xff pattern:$0x75316420]  ;;  %2215 = vmatpush.bf16.msrb.mxu3 %v2491_v12  ;;  %v1529_v23 = vmax.f32 %v1527_v36, %v1528_v2  ;;  %v1996_v12 = vrot.slane %v1995_v46, 4 }
 0x3ba   :  { %v1910_v6 = vrot.slane %v1878_v51, 4  ;;  %1941 = vst [vmem:[#allocation1] ss:$2 sm:$0xff] %v1878_v51  ;;  %v740_v51 = vrot.slane %v739_v59, 4  ;;  %v735_v47 = vmax.f32 %v733_v42, %v734_v3 }
 0x3bb   :  { %v1940_v0 = vld.sshfl [vmem:[#allocation1 + $0x30] sm:$0xff pattern:$0x75316420]  ;;  %v1997_v36 = vmax.f32 %v1995_v46, %v1996_v12 }
 0x3bc   :  { %1942 = vst [vmem:[#allocation1 + $0x1] ss:$2 sm:$0xff] %v1910_v6  ;;  %v2002_v37 = vsel %vm1977_vm8, %v1940_v0, -inf  ;;  %v736_v55 = vrot.slane %v735_v47, 1  ;;  %v1522_v0 = vrot.slane %v1521_v60, 2 }
 0x3bd   :  { %2216 = vmatpush.bf16.msrb.mxu3 %v2490_v27  ;;  %v2003_v34 = vmax.f32 %v1939_v56, %v2002_v37  ;;  %v1980_v56 = vrot.slane %v1979_v24, 4 }
 0x3be   :  { %v3200_v35 = vmax.f32 %v735_v47, %v736_v55 }
 0x3bf   :  { %v1840_v11 = vpop.f32.mrf.mxu2  ;;  %v1879_v62 = vpop.f32.mrf.mxu3  ;;  %v2004_v57 = vrot.slane %v2003_v34, 4  ;;  %v1981_v41 = vmax.f32 %v1979_v24, %v1980_v56  ;;  %v1998_v24 = vrot.slane %v1997_v36, 2 }
 0x3c0   :  { %v1880_v22 = vadd.f32 %v1879_v62, %v1840_v11  ;;  %v728_v11 = vrot.slane %v3161_v20, 1  ;;  %v3181_v62 = vmax.f32 %v739_v59, %v740_v51  ;;  %v1543_v59 = vmax.f32 %v3029_v32, %v1542_v48 }
 0x3c1   :  { %v2005_v27 = vmax.f32 %v2003_v34, %v2004_v57  ;;  %v1982_v2 = vrot.slane %v1981_v41, 2 }
 0x3c2   :  { %v1911_v49 = vrot.slane %v1880_v22, 4  ;;  %1943 = vst [vmem:[#allocation1 + $0x10] ss:$2 sm:$0xff] %v1880_v22  ;;  %v1512_v22 = vrot.slane %v1511_v26, 4  ;;  %v742_v54 = vrot.slane %v3181_v62, 2  ;;  %v3198_v17 = vmax.f32 %v3161_v20, %v728_v11 }
 0x3c3   :  { %v1944_v1 = vld.sshfl [vmem:[#allocation1] sm:$0xff pattern:$0x75316420]  ;;  %v1507_v11 = vmax.f32 %v1505_v61, %v1506_v25  ;;  %v2006_v58 = vrot.slane %v2005_v27, 2  ;;  %v1999_v25 = vmax.f32 %v1997_v36, %v1998_v24 }
 0x3c4   :  { %1946 = vst [vmem:[#allocation1 + $0x20] ss:$2 sm:$0xff] %v1911_v49  ;;  %v1513_v53 = vmax.f32 %v1511_v26, %v1512_v22  ;;  %v747_v26 = vmax.f32 %v2912_v9, %v746_v29  ;;  %v1523_v22 = vmax.f32 %v1521_v60, %v1522_v0  ;;  %v1558_v9 = vsel %vm1501_vm7, %v3077_v63, -inf }
 0x3c5   :  { %v3207_v61 = vmax.f32 %v3181_v62, %v742_v54  ;;  %v1508_v4 = vrot.slane %v1507_v11, 1  ;;  %v2007_v57 = vmax.f32 %v2005_v27, %v2006_v58  ;;  %v2000_v0 = vrot.slane %v1999_v25, 1 }
 0x3c7   :  { %v1843_v28 = vpop.f32.mrf.mxu2  ;;  %v1882_v13 = vpop.f32.mrf.mxu3 }
 0x3c8   :  { %v1883_v6 = vadd.f32 %v1882_v13, %v1843_v28  ;;  %v1544_v28 = vrot.slane %v1543_v59, 4  ;;  %v1551_v13 = vmax.f32 %v3041_v14, %v1550_v10  ;;  %v1538_v14 = vrot.slane %v1537_v18, 2 }
 0x3c9   :  { %v1945_v44 = vld.sshfl [vmem:[#allocation1 + $0x10] sm:$0xff pattern:$0x75316420]  ;;  %v1983_v10 = vmax.f32 %v1981_v41, %v1982_v2 }
 0x3ca   :  { %v1912_v33 = vrot.slane %v1883_v6, 4  ;;  %1947 = vst [vmem:[#allocation1 + $0x21] ss:$2 sm:$0xff] %v1883_v6  ;;  %v2010_v50 = vsel %vm1977_vm8, %v1945_v44, -inf  ;;  %v1514_v6 = vrot.slane %v1513_v53, 2  ;;  %v1545_v20 = vmax.f32 %v1543_v59, %v1544_v28 }
 0x3cb   :  { %v2011_v43 = vmax.f32 %v1944_v1, %v2010_v50  ;;  %v1552_v52 = vrot.slane %v1551_v13, 4  ;;  %v1539_v1 = vmax.f32 %v1537_v18, %v1538_v14  ;;  %v1559_v59 = vmax.f32 %v3058_v5, %v1558_v9 }
 0x3cc   :  { %1948 = vst [vmem:[#allocation1 + $0x30] ss:$2 sm:$0xff] %v1912_v33  ;;  %v1530_v33 = vrot.slane %v1529_v23, 2  ;;  %v1515_v48 = vmax.f32 %v1513_v53, %v1514_v6  ;;  %v1546_v34 = vrot.slane %v1545_v20, 2  ;;  %v1524_v53 = vrot.slane %v1523_v22, 1 }
 0x3cd   :  { %v2012_v51 = vrot.slane %v2011_v43, 4  ;;  %v1540_v12 = vrot.slane %v1539_v1, 1  ;;  %v1509_v28 = vmax.f32 %v1507_v11, %v1508_v4  ;;  %v1984_v6 = vrot.slane %v1983_v10, 1 }
 0x3ce   :  { %v1531_v55 = vmax.f32 %v1529_v23, %v1530_v33  ;;  %v1516_v63 = vrot.slane %v1515_v48, 1  ;;  %v2008_v14 = vrot.slane %v2007_v57, 1  ;;  %v2001_v9 = vmax.f32 %v1999_v25, %v2000_v0 }
 0x3cf   :  { %v1845_v49 = vpop.f32.mrf.mxu2  ;;  %v1884_v42 = vpop.f32.mrf.mxu3  ;;  %v2013_v50 = vmax.f32 %v2011_v43, %v2012_v51 }
 0x3d0   :  { %v1885_v19 = vadd.f32 %v1884_v42, %v1845_v49  ;;  %v1553_v49 = vmax.f32 %v1551_v13, %v1552_v52  ;;  %v1991_v42 = vmax.f32 %v1989_v21, %v1990_v7  ;;  %v1532_v60 = vrot.slane %v1531_v55, 1 }
 0x3d1   :  { %v1949_v40 = vld.sshfl [vmem:[#allocation1 + $0x20] sm:$0xff pattern:$0x75316420]  ;;  %v2014_v43 = vrot.slane %v2013_v50, 2  ;;  %v1517_v13 = vmax.f32 %v1515_v48, %v1516_v63  ;;  %v1541_v48 = vmax.f32 %v1539_v1, %v1540_v12  ;;  %v2009_v24 = vmax.f32 %v2007_v57, %v2008_v14 }
 0x3d2   :  { %v1913_v3 = vrot.slane %v1885_v19, 4  ;;  %1951 = vst [vmem:[#allocation1] ss:$2 sm:$0xff] %v1885_v19  ;;  %v748_v19 = vrot.slane %v747_v26, 4  ;;  %v1554_v18 = vrot.slane %v1553_v49, 2  ;;  %v1992_v62 = vrot.slane %v1991_v42, 1 }
 0x3d3   :  { %v1950_v32 = vld.sshfl [vmem:[#allocation1 + $0x30] sm:$0xff pattern:$0x75316420]  ;;  %v2015_v5 = vmax.f32 %v2013_v50, %v2014_v43  ;;  %v1567_v50 = vadd.f32 %v1517_v13, %v3165_v16  ;;  %v1570_v16 = vadd.f32 %v1541_v48, %v3198_v17  ;;  %v3220_v63 = vld [vmem:[%s3258_s2] ss:$0 sm:$0xff] }
 0x3d4   :  { %1952 = vst [vmem:[#allocation1 + $0x1] ss:$2 sm:$0xff] %v1913_v3  ;;  %v2018_v30 = vsel %vm1977_vm8, %v1950_v32, -inf  ;;  %v1547_v3 = vmax.f32 %v1545_v20, %v1546_v34  ;;  %v1560_v32 = vrot.slane %v1559_v59, 4  ;;  %v749_v51 = vmax.f32 %v747_v26, %v748_v19 }
 0x3d5   :  { %v2019_v44 = vmax.f32 %v1949_v40, %v2018_v30  ;;  %v1555_v33 = vmax.f32 %v1553_v49, %v1554_v18  ;;  %v2016_v52 = vrot.slane %v2015_v5, 1  ;;  %v1566_v26 = vadd.f32 %v1509_v28, %v3153_v15 }
 0x3d6   :  { %v1548_v36 = vrot.slane %v1547_v3, 1  ;;  %v1561_v20 = vmax.f32 %v1559_v59, %v1560_v32  ;;  %v750_v4 = vrot.slane %v749_v51, 2 }
 0x3d7   :  { %v1848_v8 = vpop.f32.mrf.mxu2  ;;  %v1887_v45 = vpop.f32.mrf.mxu3  ;;  %v2020_v47 = vrot.slane %v2019_v44, 4  ;;  %v1556_v2 = vrot.slane %v1555_v33, 1  ;;  %v2017_v49 = vmax.f32 %v2015_v5, %v2016_v52 }
 0x3d8   :  { %v1888_v37 = vadd.f32 %v1887_v45, %v1848_v8  ;;  %v1993_v8 = vmax.f32 %v1991_v42, %v1992_v62  ;;  %v1525_v45 = vmax.f32 %v1523_v22, %v1524_v53  ;;  %v1562_v34 = vrot.slane %v1561_v20, 2 }
 0x3d9   :  { %v2021_v39 = vmax.f32 %v2019_v44, %v2020_v47  ;;  %v1533_v47 = vmax.f32 %v1531_v55, %v1532_v60  ;;  %v744_v42 = vrot.slane %v3207_v61, 1  ;;  %v1557_v19 = vmax.f32 %v1555_v33, %v1556_v2 }
 0x3da   :  { %v1914_v46 = vrot.slane %v1888_v37, 4  ;;  %1953 = vst [vmem:[#allocation1 + $0x10] ss:$2 sm:$0xff] %v1888_v37  ;;  %v1985_v37 = vmax.f32 %v1983_v10, %v1984_v6  ;;  %v2043_v58 = vadd.f32 %v1993_v8, %v1567_v50  ;;  %v1568_v22 = vadd.f32 %v1525_v45, %v3170_v38 }
 0x3db   :  { %v2022_v29 = vrot.slane %v2021_v39, 2  ;;  %v1954_v21 = vld.sshfl [vmem:[#allocation1] sm:$0xff pattern:$0x75316420]  ;;  %v1569_v15 = vadd.f32 %v1533_v47, %v3174_v31  ;;  %v1563_v53 = vmax.f32 %v1561_v20, %v1562_v34  ;;  %v745_v17 = vmax.f32 %v3207_v61, %v744_v42 }
 0x3dc   :  { %1956 = vst [vmem:[#allocation1 + $0x20] ss:$2 sm:$0xff] %v1914_v46  ;;  %v2042_v43 = vadd.f32 %v1985_v37, %v1566_v26  ;;  %v2044_v1 = vadd.f32 %v2001_v9, %v1568_v22  ;;  %v751_v57 = vmax.f32 %v749_v51, %v750_v4 }
 0x3dd   :  { %v2023_v30 = vmax.f32 %v2021_v39, %v2022_v29  ;;  %v1549_v39 = vmax.f32 %v1547_v3, %v1548_v36  ;;  %v2045_v25 = vadd.f32 %v2009_v24, %v1569_v15  ;;  %v1564_v13 = vrot.slane %v1563_v53, 1 }
 0x3de   :  { %v2054_v62 = vadd.f32 %v3220_v63, %v2042_v43  ;;  %v752_v0 = vrot.slane %v751_v57, 1 }
 0x3df   :  { %v1850_v23 = vpop.f32.mrf.mxu2  ;;  %v1889_v56 = vpop.f32.mrf.mxu3  ;;  %v2024_v11 = vrot.slane %v2023_v30, 1  ;;  %v1571_v38 = vadd.f32 %v1549_v39, %v3200_v35  ;;  %v2056_v35 = vadd.f32 %v3220_v63, %v2044_v1  ;;  %v2057_v28 = vadd.f32 %v3220_v63, %v2045_v25 }
 0x3e0   :  { %v1890_v54 = vadd.f32 %v1889_v56, %v1850_v23  ;;  %v2046_v23 = vadd.f32 %v2017_v49, %v1570_v16  ;;  %v2055_v56 = vadd.f32 %v3220_v63, %v2043_v58  ;;  %v1565_v14 = vmax.f32 %v1563_v53, %v1564_v13 }
 0x3e1   :  { %v1955_v40 = vld.sshfl [vmem:[#allocation1 + $0x10] sm:$0xff pattern:$0x75316420]  ;;  %v2025_v55 = vmax.f32 %v2023_v30, %v2024_v11  ;;  %v2064_v51 = vmax.f32 %v2056_v35, 0.0  ;;  %v2065_v33 = vmax.f32 %v2057_v28, 0.0  ;;  %v753_v52 = vmax.f32 %v751_v57, %v752_v0 }
 0x3e2   :  { %v1915_v44 = vrot.slane %v1890_v54, 4  ;;  %1957 = vst [vmem:[#allocation1 + $0x21] ss:$2 sm:$0xff] %v1890_v54  ;;  %v2026_v41 = vsel %vm1977_vm8, %v1955_v40, -inf  ;;  %v1572_v54 = vadd.f32 %v1557_v19, %v745_v17  ;;  %v2063_v40 = vmax.f32 %v2055_v56, 0.0 }
 0x3e3   :  { %v2027_v27 = vmax.f32 %v1954_v21, %v2026_v41  ;;  %v2047_v18 = vadd.f32 %v2025_v55, %v1571_v38  ;;  %v2058_v21 = vadd.f32 %v3220_v63, %v2046_v23  ;;  %v2103_v11 = vpack.c.bf16 %v2064_v51, %v2064_v51 }
 0x3e4   :  { %1958 = vst [vmem:[#allocation1 + $0x30] ss:$2 sm:$0xff] %v1915_v44  ;;  %v2062_v44 = vmax.f32 %v2054_v62, 0.0  ;;  %v2102_v8 = vpack.c.bf16 %v2063_v40, %v2063_v40  ;;  %v2104_v37 = vpack.c.bf16 %v2065_v33, %v2065_v33  ;;  %v2078_v50 = vrot.slane %v2063_v40, 7 }
 0x3e5   :  { %v2028_v7 = vrot.slane %v2027_v27, 4  ;;  %v2059_v61 = vadd.f32 %v3220_v63, %v2047_v18  ;;  %v1573_v48 = vadd.f32 %v1565_v14, %v753_v52  ;;  %v2139_v22 = vunpack.c.l.b16 %v2103_v11 }
 0x3e6   :  { %v2101_v47 = vpack.c.bf16 %v2062_v44, %v2062_v44  ;;  %v2138_v39 = vunpack.c.l.b16 %v2102_v8  ;;  %v2140_v42 = vunpack.c.l.b16 %v2104_v37  ;;  %v2080_v15 = vsel %vm2079_vm9, %v2078_v50, %v2062_v44 }
 0x3e7   :  { %v2029_v46 = vmax.f32 %v2027_v27, %v2028_v7  ;;  %v2066_v27 = vmax.f32 %v2058_v21, 0.0  ;;  %v2067_v20 = vmax.f32 %v2059_v61, 0.0  ;;  %v2084_v55 = vrot.slane %v2065_v33, 5  ;;  %v2508_v61 = vld [vmem:[%s3260_s4] ss:$0 sm:$0xff] }
 0x3e8   :  { %v2137_v34 = vunpack.c.l.b16 %v2101_v47  ;;  %v2145_v43 = vrot.slane %v2138_v39, 7 }
 0x3e9   :  { %v2030_v59 = vrot.slane %v2029_v46, 2  ;;  %v1959_v31 = vld.sshfl [vmem:[#allocation1 + $0x20] sm:$0xff pattern:$0x75316420]  ;;  %v2105_v9 = vpack.c.bf16 %v2066_v27, %v2066_v27  ;;  %v2106_v24 = vpack.c.bf16 %v2067_v20, %v2067_v20  ;;  %v2087_v4 = vrot.slane %v2066_v27, 4 }
 0x3ea   :  { %v2090_v38 = vrot.slane %v2067_v20, 3  ;;  %v2146_v23 = vsel %vm2079_vm9, %v2145_v43, %v2137_v34 }
 0x3eb   :  { %v1960_v29 = vld.sshfl [vmem:[#allocation1 + $0x30] sm:$0xff pattern:$0x75316420]  ;;  %v2031_v10 = vmax.f32 %v2029_v46, %v2030_v59  ;;  %v2081_v46 = vrot.slane %v2064_v51, 6  ;;  %v2141_v59 = vunpack.c.l.b16 %v2105_v9  ;;  %v2142_v1 = vunpack.c.l.b16 %v2106_v24 }
 0x3ec   :  { %v2034_v60 = vsel %vm1977_vm8, %v1960_v29, -inf }
 0x3ed   :  { %v2032_v12 = vrot.slane %v2031_v10, 1  ;;  %v2035_v3 = vmax.f32 %v1959_v31, %v2034_v60  ;;  %v2083_v19 = vsel %vm2082_vm10, %v2081_v46, %v2080_v15  ;;  %v2149_v31 = vrot.slane %v2140_v42, 5 }
 0x3ee   :  { %v2086_v60 = vsel %vm2085_vm11, %v2084_v55, %v2083_v19  ;;  %v2151_v56 = vrot.slane %v2141_v59, 4 }
 0x3ef   :  { %v2033_v32 = vmax.f32 %v2031_v10, %v2032_v12  ;;  %v2036_v5 = vrot.slane %v2035_v3, 4  ;;  %v2147_v10 = vrot.slane %v2139_v22, 6  ;;  %v2089_v17 = vsel %vm2088_vm12, %v2087_v4, %v2086_v60 }
 0x3f0   :  { %v2153_v12 = vrot.slane %v2142_v1, 3 }
 0x3f1   :  { %v2037_v30 = vmax.f32 %v2035_v3, %v2036_v5  ;;  %v2048_v6 = vadd.f32 %v2033_v32, %v1572_v54  ;;  %v2092_v3 = vsel %vm2091_vm13, %v2090_v38, %v2089_v17  ;;  %v2148_v57 = vsel %vm2082_vm10, %v2147_v10, %v2146_v23 }
 0x3f2   :  { %v2150_v32 = vsel %vm2085_vm11, %v2149_v31, %v2148_v57 }
 0x3f3   :  { %v2038_v41 = vrot.slane %v2037_v30, 2  ;;  %v2060_v36 = vadd.f32 %v3220_v63, %v2048_v6  ;;  %v2152_v28 = vsel %vm2088_vm12, %v2151_v56, %v2150_v32 }
 0x3f4   :  { %v2154_v13 = vsel %vm2091_vm13, %v2153_v12, %v2152_v28 }
 0x3f5   :  { %v2039_v45 = vmax.f32 %v2037_v30, %v2038_v41  ;;  %v2068_v26 = vmax.f32 %v2060_v36, 0.0 }
 0x3f7   :  { %v2040_v7 = vrot.slane %v2039_v45, 1  ;;  %v2107_v58 = vpack.c.bf16 %v2068_v26, %v2068_v26  ;;  %v2093_v25 = vrot.slane %v2068_v26, 2 }
 0x3f9   :  { %v2041_v2 = vmax.f32 %v2039_v45, %v2040_v7  ;;  %v2143_v29 = vunpack.c.l.b16 %v2107_v58  ;;  %v2095_v35 = vsel %vm2094_vm14, %v2093_v25, %v2092_v3 }
 0x3fb   :  { %v2049_v49 = vadd.f32 %v2041_v2, %v1573_v48  ;;  %v2155_v62 = vrot.slane %v2143_v29, 2 }
 0x3fd   :  { %v2061_v16 = vadd.f32 %v3220_v63, %v2049_v49  ;;  %v2156_v40 = vsel %vm2094_vm14, %v2155_v62, %v2154_v13 }
 0x3ff   :  { %v2069_v53 = vmax.f32 %v2061_v16, 0.0 }
 0x401   :  { %v2108_v63 = vpack.c.bf16 %v2069_v53, %v2069_v53  ;;  %v2096_v18 = vrot.slane %v2069_v53, 1 }
 0x403   :  { %v2144_v54 = vunpack.c.l.b16 %v2108_v63  ;;  %v2098_v5 = vsel %vm2097_vm15, %v2096_v18, %v2095_v35 }
 0x404   :  { %2100 = vst [vmem:[#allocation8] sm:$0xff] %v2098_v5 }
 0x405   :  { %v2157_v21 = vrot.slane %v2144_v54, 1  ;;  %2233 = dma.vmem_to_hbm [thread:$0]  %s2229_s18, 128, %s2231_s16, [#allocation4]  }
 0x407   :  { %v2158_v30 = vsel %vm2097_vm15, %v2157_v21, %v2156_v40 }
 0x408   :  { %v2159_v6 = vpack.c.b16 %v2158_v30, %v2158_v30 }
 0x40a   :  { %2217 = vmatmul.bf16.vlgmr.msrb.gmra.mxu3 %v2159_v6 }
 0x48d   :  { %v2218_v0 = vpop.f32.mrf.mxu3 }
 0x48e   :  { %v2219_v44 = vadd.f32 %v2508_v61, %v2218_v0 }
 0x490   :  { %2222 = vst [vmem:[#allocation9] sm:$0xff] %v2219_v44 }
 0x491   :  { %2244 = dma.vmem_to_hbm [thread:$0]  %s2240_s22, 128, %s2242_s25, [#allocation10]  }
 0x495   :  { %v2220_v51 = vpop.f32.mrf.mxu3 }
 0x496   :  { %2641 = dma.done.wait [#allocation4], 128  }
 0x497   :  { %2642 = vsyncadd [#allocation4], 4294967168 }
 0x498   :  { %2643 = dma.done.wait [#allocation10], 128  }
 0x499   :  { %2644 = vsyncadd [#allocation10], 4294967168 }
 0x49a   :  { %2253 = vsyncpa [#allocation3], 1 }
 0x49b   :  { %2254 = vsyncpa [#allocation6], 1 }
 0x49c   :  { %2255 = vsyncpa [#allocation4], 1 }
 0x49d   :  { %2256 = vsyncpa [#allocation10], 1 }

</bundles_post_ra>
